<compile_context>
chip_gen: v7x
topology: tpu7x:2x2x1
jax: 0.10.0
libtpu: 0.0.40
codegen_flags: <defaults>
</compile_context>

<pallas_src>
import numpy as np

import jax
import jax.numpy as jnp
from jax import lax
from jax.experimental import pallas as pl
from jax.experimental.pallas import tpu as pltpu


# ----------------------------- Pallas kernels ------------------------------

def _conv_pool_kernel(x_ref, w_ref, b_ref, o_ref):
    # x_ref: (TM, K) bf16 slab-LHS; w_ref: (K, 512) bf16 Toeplitz weight
    # b_ref: (1, 128) f32; o_ref: (TM, 128) bf16
    acc = jnp.dot(x_ref[...], w_ref[...],
                  preferred_element_type=jnp.float32)          # (TM, 512) f32
    # max over the four (pool-dh, pool-dw) candidates (128-aligned lane slabs)
    m = jnp.maximum(jnp.maximum(acc[:, 0:128], acc[:, 128:256]),
                    jnp.maximum(acc[:, 256:384], acc[:, 384:512]))
    o_ref[...] = jnp.maximum(m + b_ref[...], 0.0).astype(o_ref.dtype)


def _mlp_kernel(x_ref, w0_ref, b0_ref, w1_ref, b1_ref, o_ref):
    # x_ref: (TB, 896) bf16; w0: (896, 128) bf16; w1: (128, 128) bf16
    h = jnp.dot(x_ref[...], w0_ref[...], preferred_element_type=jnp.float32)
    h = jnp.maximum(h + b0_ref[...], 0.0)
    out = jnp.dot(h.astype(w1_ref.dtype), w1_ref[...],
                  preferred_element_type=jnp.float32) + b1_ref[...]
    o_ref[...] = out.astype(o_ref.dtype)


# ----------------------------- Pallas wrappers ------------------------------

def _round_up(x, m):
    return -(-x // m) * m


def _pick_tile(M, tile_m):
    """bf16-friendly (mult of 16) tile; >= 2 grid steps whenever M allows."""
    Mp = _round_up(M, 16)
    tile = min(tile_m, _round_up(-(-Mp // 2), 16))
    Mp = _round_up(Mp, tile)
    return Mp, tile


_CPARAMS = pltpu.CompilerParams(dimension_semantics=("parallel",),
                                vmem_limit_bytes=32 * 1024 * 1024)


def conv_pool(x, w, b, *, tile_m):
    """x: (M, K) bf16; w: (K, 512) bf16; b: (1, 128) f32 -> (M, 128) bf16.

    Computes relu(max over the four 128-lane pooling candidates of x @ w + b).
    """
    M, K = x.shape
    Mp, tile = _pick_tile(M, tile_m)
    if Mp != M:
        x = jnp.pad(x, ((0, Mp - M), (0, 0)))
    out = pl.pallas_call(
        _conv_pool_kernel,
        out_shape=jax.ShapeDtypeStruct((Mp, 128), jnp.bfloat16),
        grid=(Mp // tile,),
        in_specs=[
            pl.BlockSpec((tile, K), lambda i: (i, 0)),
            pl.BlockSpec((K, 512), lambda i: (0, 0)),
            pl.BlockSpec((1, 128), lambda i: (0, 0)),
        ],
        out_specs=pl.BlockSpec((tile, 128), lambda i: (i, 0)),
        compiler_params=_CPARAMS,
    )(x, w, b)
    return out[:M]


def fused_mlp(x, w0, b0, w1, b1, *, tile_m=512):
    """x: (B, 896) bf16 -> (B, 128) f32 = relu(x @ w0 + b0) @ w1 + b1."""
    B, K = x.shape
    Bp, tile = _pick_tile(B, tile_m)
    if Bp != B:
        x = jnp.pad(x, ((0, Bp - B), (0, 0)))
    out = pl.pallas_call(
        _mlp_kernel,
        out_shape=jax.ShapeDtypeStruct((Bp, 128), jnp.float32),
        grid=(Bp // tile,),
        in_specs=[
            pl.BlockSpec((tile, K), lambda i: (i, 0)),
            pl.BlockSpec((K, 128), lambda i: (0, 0)),
            pl.BlockSpec((1, 128), lambda i: (0, 0)),
            pl.BlockSpec((128, 128), lambda i: (0, 0)),
            pl.BlockSpec((1, 128), lambda i: (0, 0)),
        ],
        out_specs=pl.BlockSpec((tile, 128), lambda i: (i, 0)),
        compiler_params=_CPARAMS,
    )(x, w0, b0, w1, b1)
    return out[:B]


# ------------------------------- JAX glue ----------------------------------

def _pool_slabs(x, n_rows):
    """x: (B, Hp, L) -> (B*n_rows, 6*L).

    Slab v (v = pool_dh + kh in 0..5) holds padded-image rows {2*r + v}, so the
    kernel's single Toeplitz matmul covers all kernel rows and both pooling
    rows.  Lane order is (v, original lane).
    """
    B, _, L = x.shape
    slabs = [x[:, v:v + 2 * n_rows - 1:2, :] for v in range(6)]
    return jnp.concatenate(slabs, axis=-1).reshape(B * n_rows, 6 * L)


def init_params(key):
    def uniform(k, shape, fan_in):
        bound = float(fan_in) ** -0.5
        return jax.random.uniform(k, shape, jnp.float32, -bound, bound)

    ks = jax.random.split(key, 8)
    return dict(
        w0=uniform(ks[0], (6, 1, 5, 5), 1 * 25),
        b0=uniform(ks[1], (6,), 1 * 25),
        w1=uniform(ks[2], (16, 6, 5, 5), 6 * 25),
        b1=uniform(ks[3], (16,), 6 * 25),
        wl0=uniform(ks[4], (84, 16 * 7 * 7), 16 * 7 * 7),
        bl0=uniform(ks[5], (84,), 16 * 7 * 7),
        wl1=uniform(ks[6], (10, 84), 84),
        bl1=uniform(ks[7], (10,), 84),
    )


def prepare_params(params):
    """One-time (host-side, numpy) repack into Toeplitz / permuted bf16 weights.

    conv0: rows (v, iw) over the 32-wide padded frame -> (192, 512)
    conv1: rows (v, iw, c) over conv0's 16x8 output frame -> (768, 512)
    Output columns for both convs: (dh, dw, 128-lane slab of (pool_w, ch)),
    so the kernel's 4-way lane-slab max implements the 2x2 max-pool and the
    channel / width zero padding is folded into the next layer's weight.
    """
    w0 = np.asarray(params["w0"], np.float32)
    b0 = np.asarray(params["b0"], np.float32)
    w1 = np.asarray(params["w1"], np.float32)
    b1 = np.asarray(params["b1"], np.float32)
    wl0 = np.asarray(params["wl0"], np.float32)
    bl0 = np.asarray(params["bl0"], np.float32)
    wl1 = np.asarray(params["wl1"], np.float32)
    bl1 = np.asarray(params["bl1"], np.float32)

    # conv0 (1 -> 6ch): output lane within a slab = pw*8 + o  (pw<14, o<6 real)
    W0 = np.zeros((6, 32, 2, 2, 16, 8), np.float32)
    for dh in range(2):
        for dw in range(2):
            for kh in range(5):
                for kw in range(5):
                    for pw in range(14):
                        W0[dh + kh, 2 * pw + dw + kw, dh, dw, pw, :6] = \
                            w0[:, 0, kh, kw]
    W0 = W0.reshape(192, 512)
    B0 = np.zeros((16, 8), np.float32)
    B0[:14, :6] = b0[None, :]
    B0 = B0.reshape(1, 128)

    # conv1 (6 -> 16ch): input frame is conv0's (16 cols x 8 ch) 128-lane rows;
    # output lane within a slab = pw*16 + o  (pw<7 real).
    W1 = np.zeros((6, 16, 8, 2, 2, 8, 16), np.float32)
    for dh in range(2):
        for dw in range(2):
            for kh in range(5):
                for kw in range(5):
                    for pw in range(7):
                        ic = 2 * pw + dw + kw - 2   # spatial padding folded in
                        if 0 <= ic < 14:
                            W1[dh + kh, ic, :6, dh, dw, pw, :] = \
                                w1[:, :, kh, kw].T
    W1 = W1.reshape(768, 512)
    B1 = np.zeros((8, 16), np.float32)
    B1[:7, :] = b1[None, :]
    B1 = B1.reshape(1, 128)

    # FC0: features arrive as (oh, pw(8, 7 used), o(16)) = 896 lanes.
    WL0 = np.zeros((7, 8, 16, 128), np.float32)
    WL0[:, :7, :, :84] = wl0.T.reshape(16, 7, 7, 84).transpose(1, 2, 0, 3)
    WL0 = WL0.reshape(896, 128)
    BL0 = np.zeros((1, 128), np.float32)
    BL0[0, :84] = bl0

    WL1 = np.zeros((128, 128), np.float32)
    WL1[:84, :10] = wl1.T
    BL1 = np.zeros((1, 128), np.float32)
    BL1[0, :10] = bl1

    bf = jnp.bfloat16
    return dict(
        w0=jnp.asarray(W0, bf), b0=jnp.asarray(B0),
        w1=jnp.asarray(W1, bf), b1=jnp.asarray(B1),
        wl0=jnp.asarray(WL0, bf), bl0=jnp.asarray(BL0),
        wl1=jnp.asarray(WL1, bf), bl1=jnp.asarray(BL1),
    )


def cnn_forward(x, prep):
    # Mirrors CNN.forward: reshape to (B, 1, 28, 28) if input is not 4D.
    if x.ndim != 4:
        x = x.reshape(x.shape[0], 1, 28, 28)
    B = x.shape[0]

    # conv0 (1->6, 5x5, pad 2) + ReLU + 2x2 maxpool -- one fused Pallas call.
    x0 = x.reshape(B, 28, 28).astype(jnp.bfloat16)
    x0 = jnp.pad(x0, ((0, 0), (2, 2), (2, 2)))              # (B, 32, 32)
    a0 = _pool_slabs(x0, 14)                                # (B*14, 192)
    p0 = conv_pool(a0, prep["w0"], prep["b0"], tile_m=2048)[:B * 14]
    # p0 rows = (b, pooled_h), lanes = (pooled_w(16, 14 used), ch(8, 6 used))

    # conv1 (6->16, 5x5, pad 2) + ReLU + 2x2 maxpool.
    x1 = jnp.pad(p0.reshape(B, 14, 128), ((0, 0), (2, 2), (0, 0)))  # (B, 18, 128)
    a1 = _pool_slabs(x1, 7)                                 # (B*7, 768)
    p1 = conv_pool(a1, prep["w1"], prep["b1"], tile_m=1024)[:B * 7]
    # p1 rows = (b, pooled_h), lanes = (pooled_w(8, 7 used), ch(16))

    # Flatten is a free view; the channel permutation lives in the repacked wl0.
    feat = p1.reshape(B, 7 * 128)                           # (B, 896) bf16

    out = fused_mlp(feat, prep["wl0"], prep["bl0"], prep["wl1"], prep["bl1"])
    return out[:, :10]


# Pure-JAX reference (no Pallas) used only to sanity-check semantics.
def ref_forward(x, params):
    if x.ndim != 4:
        x = x.reshape(x.shape[0], 1, 28, 28)
    dn = ("NCHW", "OIHW", "NCHW")
    y = lax.conv_general_dilated(x, params["w0"], (1, 1), ((2, 2), (2, 2)),
                                 dimension_numbers=dn,
                                 precision=lax.Precision.HIGHEST)
    y = jnp.maximum(y + params["b0"][None, :, None, None], 0.0)
    y = lax.reduce_window(y, -jnp.inf, lax.max, (1, 1, 2, 2), (1, 1, 2, 2), "VALID")
    y = lax.conv_general_dilated(y, params["w1"], (1, 1), ((2, 2), (2, 2)),
                                 dimension_numbers=dn,
                                 precision=lax.Precision.HIGHEST)
    y = jnp.maximum(y + params["b1"][None, :, None, None], 0.0)
    y = lax.reduce_window(y, -jnp.inf, lax.max, (1, 1, 2, 2), (1, 1, 2, 2), "VALID")
    y = y.reshape(y.shape[0], -1)
    y = jnp.maximum(y @ params["wl0"].T + params["bl0"], 0.0)
    return y @ params["wl1"].T + params["bl1"]


if __name__ == "__main__":
    key = jax.random.PRNGKey(0)
    k_x, k_p = jax.random.split(key)
    params = init_params(k_p)
    prep = prepare_params(params)
    x = jax.random.normal(k_x, (4, 1, 28, 28), jnp.float32)

    out = jax.jit(cnn_forward)(x, prep)
    out = jax.block_until_ready(out)
    assert out.shape == (4, 10), out.shape

    ref = ref_forward(x, params)
    max_err = float(jnp.max(jnp.abs(out - ref)))
    assert jnp.allclose(out, ref, rtol=2e-2, atol=2e-2), max_err

    print("KERNEL_OK")
</pallas_src>

<mosaic_0001>
module attributes {stable_mosaic.version = 11 : i64} {
  func.func @_conv_pool_kernel(%arg0: i32, %arg1: memref<32x192xbf16, #tpu.memory_space<vmem>>, %arg2: memref<192x512xbf16, #tpu.memory_space<vmem>>, %arg3: memref<1x128xf32, #tpu.memory_space<vmem>>, %arg4: memref<32x128xbf16, #tpu.memory_space<vmem>>) attributes {dimension_semantics = [#tpu.dimension_semantics<parallel>], iteration_bounds = array<i64: 2>, scalar_prefetch = 0 : i64, scratch_operands = 0 : i64, tpu.core_type = #tpu.core_type<tc>, window_params = [{transform_indices = @transform_0, window_bounds = array<i64: 32, 192>}, {pipeline_mode = #tpu.pipeline_mode<synchronous>, transform_indices = @transform_1, window_bounds = array<i64: 192, 512>}, {pipeline_mode = #tpu.pipeline_mode<synchronous>, transform_indices = @transform_2, window_bounds = array<i64: 1, 128>}, {transform_indices = @transform_3, window_bounds = array<i64: 32, 128>}]} {
    %c0 = arith.constant 0 : index
    %c0_0 = arith.constant 0 : index
    %0 = vector.load %arg1[%c0, %c0_0] : memref<32x192xbf16, #tpu.memory_space<vmem>>, vector<32x192xbf16>
    %c0_1 = arith.constant 0 : index
    %c0_2 = arith.constant 0 : index
    %1 = vector.load %arg2[%c0_1, %c0_2] : memref<192x512xbf16, #tpu.memory_space<vmem>>, vector<192x512xbf16>
    %cst = arith.constant dense<0.000000e+00> : vector<32x512xf32>
    %2 = tpu.matmul %0, %1, %cst {dimension_numbers = #tpu.dot_dimension_numbers<[1], [0], [0], [1], [0, 0, 1, 1], [], []>} : vector<32x192xbf16>, vector<192x512xbf16>, vector<32x512xf32> -> vector<32x512xf32>
    %3 = vector.extract_strided_slice %2 {offsets = [0, 0], sizes = [32, 128], strides = [1, 1]} : vector<32x512xf32> to vector<32x128xf32>
    %4 = vector.extract_strided_slice %2 {offsets = [0, 128], sizes = [32, 128], strides = [1, 1]} : vector<32x512xf32> to vector<32x128xf32>
    %5 = arith.maximumf %3, %4 : vector<32x128xf32>
    %6 = vector.extract_strided_slice %2 {offsets = [0, 256], sizes = [32, 128], strides = [1, 1]} : vector<32x512xf32> to vector<32x128xf32>
    %7 = vector.extract_strided_slice %2 {offsets = [0, 384], sizes = [32, 128], strides = [1, 1]} : vector<32x512xf32> to vector<32x128xf32>
    %8 = arith.maximumf %6, %7 : vector<32x128xf32>
    %9 = arith.maximumf %5, %8 : vector<32x128xf32>
    %c0_3 = arith.constant 0 : index
    %c0_4 = arith.constant 0 : index
    %10 = vector.load %arg3[%c0_3, %c0_4] : memref<1x128xf32, #tpu.memory_space<vmem>>, vector<1x128xf32>
    %11 = vector.broadcast %10 : vector<1x128xf32> to vector<32x128xf32>
    %12 = arith.addf %9, %11 : vector<32x128xf32>
    %cst_5 = arith.constant 0.000000e+00 : f32
    %13 = vector.broadcast %cst_5 : f32 to vector<32x128xf32>
    %14 = arith.maximumf %12, %13 : vector<32x128xf32>
    %15 = arith.truncf %14 : vector<32x128xf32> to vector<32x128xbf16>
    %c0_6 = arith.constant 0 : index
    %c0_7 = arith.constant 0 : index
    %16 = vector.load %arg4[%c0_6, %c0_7] : memref<32x128xbf16, #tpu.memory_space<vmem>>, vector<32x128xbf16>
    tpu.vector_store %arg4[%c0_6, %c0_7], %15 {strides = array<i32>} : memref<32x128xbf16, #tpu.memory_space<vmem>>, vector<32x128xbf16>,
    return
  }
  func.func @transform_0(%arg0: i32) -> (i32, i32) {
    %c0_i32 = arith.constant 0 : i32
    %c0_i32_0 = arith.constant 0 : i32
    return %arg0, %c0_i32 : i32, i32
  }
  func.func @transform_1(%arg0: i32) -> (i32, i32) {
    %c0_i32 = arith.constant 0 : i32
    %c0_i32_0 = arith.constant 0 : i32
    %c0_i32_1 = arith.constant 0 : i32
    return %c0_i32, %c0_i32_0 : i32, i32
  }
  func.func @transform_2(%arg0: i32) -> (i32, i32) {
    %c0_i32 = arith.constant 0 : i32
    %c0_i32_0 = arith.constant 0 : i32
    %c0_i32_1 = arith.constant 0 : i32
    return %c0_i32, %c0_i32_0 : i32, i32
  }
  func.func @transform_3(%arg0: i32) -> (i32, i32) {
    %c0_i32 = arith.constant 0 : i32
    %c0_i32_0 = arith.constant 0 : i32
    return %arg0, %c0_i32 : i32, i32
  }
}

module attributes {stable_mosaic.version = 11 : i64} {
  func.func @_conv_pool_kernel(%arg0: i32, %arg1: memref<16x768xbf16, #tpu.memory_space<vmem>>, %arg2: memref<768x512xbf16, #tpu.memory_space<vmem>>, %arg3: memref<1x128xf32, #tpu.memory_space<vmem>>, %arg4: memref<16x128xbf16, #tpu.memory_space<vmem>>) attributes {dimension_semantics = [#tpu.dimension_semantics<parallel>], iteration_bounds = array<i64: 2>, scalar_prefetch = 0 : i64, scratch_operands = 0 : i64, tpu.core_type = #tpu.core_type<tc>, window_params = [{transform_indices = @transform_0, window_bounds = array<i64: 16, 768>}, {pipeline_mode = #tpu.pipeline_mode<synchronous>, transform_indices = @transform_1, window_bounds = array<i64: 768, 512>}, {pipeline_mode = #tpu.pipeline_mode<synchronous>, transform_indices = @transform_2, window_bounds = array<i64: 1, 128>}, {transform_indices = @transform_3, window_bounds = array<i64: 16, 128>}]} {
    %c0 = arith.constant 0 : index
    %c0_0 = arith.constant 0 : index
    %0 = vector.load %arg1[%c0, %c0_0] : memref<16x768xbf16, #tpu.memory_space<vmem>>, vector<16x768xbf16>
    %c0_1 = arith.constant 0 : index
    %c0_2 = arith.constant 0 : index
    %1 = vector.load %arg2[%c0_1, %c0_2] : memref<768x512xbf16, #tpu.memory_space<vmem>>, vector<768x512xbf16>
    %cst = arith.constant dense<0.000000e+00> : vector<16x512xf32>
    %2 = tpu.matmul %0, %1, %cst {dimension_numbers = #tpu.dot_dimension_numbers<[1], [0], [0], [1], [0, 0, 1, 1], [], []>} : vector<16x768xbf16>, vector<768x512xbf16>, vector<16x512xf32> -> vector<16x512xf32>
    %3 = vector.extract_strided_slice %2 {offsets = [0, 0], sizes = [16, 128], strides = [1, 1]} : vector<16x512xf32> to vector<16x128xf32>
    %4 = vector.extract_strided_slice %2 {offsets = [0, 128], sizes = [16, 128], strides = [1, 1]} : vector<16x512xf32> to vector<16x128xf32>
    %5 = arith.maximumf %3, %4 : vector<16x128xf32>
    %6 = vector.extract_strided_slice %2 {offsets = [0, 256], sizes = [16, 128], strides = [1, 1]} : vector<16x512xf32> to vector<16x128xf32>
    %7 = vector.extract_strided_slice %2 {offsets = [0, 384], sizes = [16, 128], strides = [1, 1]} : vector<16x512xf32> to vector<16x128xf32>
    %8 = arith.maximumf %6, %7 : vector<16x128xf32>
    %9 = arith.maximumf %5, %8 : vector<16x128xf32>
    %c0_3 = arith.constant 0 : index
    %c0_4 = arith.constant 0 : index
    %10 = vector.load %arg3[%c0_3, %c0_4] : memref<1x128xf32, #tpu.memory_space<vmem>>, vector<1x128xf32>
    %11 = vector.broadcast %10 : vector<1x128xf32> to vector<16x128xf32>
    %12 = arith.addf %9, %11 : vector<16x128xf32>
    %cst_5 = arith.constant 0.000000e+00 : f32
    %13 = vector.broadcast %cst_5 : f32 to vector<16x128xf32>
    %14 = arith.maximumf %12, %13 : vector<16x128xf32>
    %15 = arith.truncf %14 : vector<16x128xf32> to vector<16x128xbf16>
    %c0_6 = arith.constant 0 : index
    %c0_7 = arith.constant 0 : index
    %16 = vector.load %arg4[%c0_6, %c0_7] : memref<16x128xbf16, #tpu.memory_space<vmem>>, vector<16x128xbf16>
    tpu.vector_store %arg4[%c0_6, %c0_7], %15 {strides = array<i32>} : memref<16x128xbf16, #tpu.memory_space<vmem>>, vector<16x128xbf16>,
    return
  }
  func.func @transform_0(%arg0: i32) -> (i32, i32) {
    %c0_i32 = arith.constant 0 : i32
    %c0_i32_0 = arith.constant 0 : i32
    return %arg0, %c0_i32 : i32, i32
  }
  func.func @transform_1(%arg0: i32) -> (i32, i32) {
    %c0_i32 = arith.constant 0 : i32
    %c0_i32_0 = arith.constant 0 : i32
    %c0_i32_1 = arith.constant 0 : i32
    return %c0_i32, %c0_i32_0 : i32, i32
  }
  func.func @transform_2(%arg0: i32) -> (i32, i32) {
    %c0_i32 = arith.constant 0 : i32
    %c0_i32_0 = arith.constant 0 : i32
    %c0_i32_1 = arith.constant 0 : i32
    return %c0_i32, %c0_i32_0 : i32, i32
  }
  func.func @transform_3(%arg0: i32) -> (i32, i32) {
    %c0_i32 = arith.constant 0 : i32
    %c0_i32_0 = arith.constant 0 : i32
    return %arg0, %c0_i32 : i32, i32
  }
}

module attributes {stable_mosaic.version = 11 : i64} {
  func.func @_mlp_kernel(%arg0: i32, %arg1: memref<16x896xbf16, #tpu.memory_space<vmem>>, %arg2: memref<896x128xbf16, #tpu.memory_space<vmem>>, %arg3: memref<1x128xf32, #tpu.memory_space<vmem>>, %arg4: memref<128x128xbf16, #tpu.memory_space<vmem>>, %arg5: memref<1x128xf32, #tpu.memory_space<vmem>>, %arg6: memref<16x128xf32, #tpu.memory_space<vmem>>) attributes {dimension_semantics = [#tpu.dimension_semantics<parallel>], iteration_bounds = array<i64: 1>, scalar_prefetch = 0 : i64, scratch_operands = 0 : i64, tpu.core_type = #tpu.core_type<tc>, window_params = [{transform_indices = @transform_0, window_bounds = array<i64: 16, 896>}, {pipeline_mode = #tpu.pipeline_mode<synchronous>, transform_indices = @transform_1, window_bounds = array<i64: 896, 128>}, {pipeline_mode = #tpu.pipeline_mode<synchronous>, transform_indices = @transform_2, window_bounds = array<i64: 1, 128>}, {pipeline_mode = #tpu.pipeline_mode<synchronous>, transform_indices = @transform_3, window_bounds = array<i64: 128, 128>}, {pipeline_mode = #tpu.pipeline_mode<synchronous>, transform_indices = @transform_4, window_bounds = array<i64: 1, 128>}, {transform_indices = @transform_5, window_bounds = array<i64: 16, 128>}]} {
    %c0 = arith.constant 0 : index
    %c0_0 = arith.constant 0 : index
    %0 = vector.load %arg1[%c0, %c0_0] : memref<16x896xbf16, #tpu.memory_space<vmem>>, vector<16x896xbf16>
    %c0_1 = arith.constant 0 : index
    %c0_2 = arith.constant 0 : index
    %1 = vector.load %arg2[%c0_1, %c0_2] : memref<896x128xbf16, #tpu.memory_space<vmem>>, vector<896x128xbf16>
    %cst = arith.constant dense<0.000000e+00> : vector<16x128xf32>
    %2 = tpu.matmul %0, %1, %cst {dimension_numbers = #tpu.dot_dimension_numbers<[1], [0], [0], [1], [0, 0, 1, 1], [], []>} : vector<16x896xbf16>, vector<896x128xbf16>, vector<16x128xf32> -> vector<16x128xf32>
    %c0_3 = arith.constant 0 : index
    %c0_4 = arith.constant 0 : index
    %3 = vector.load %arg3[%c0_3, %c0_4] : memref<1x128xf32, #tpu.memory_space<vmem>>, vector<1x128xf32>
    %4 = vector.broadcast %3 : vector<1x128xf32> to vector<16x128xf32>
    %5 = arith.addf %2, %4 : vector<16x128xf32>
    %cst_5 = arith.constant 0.000000e+00 : f32
    %6 = vector.broadcast %cst_5 : f32 to vector<16x128xf32>
    %7 = arith.maximumf %5, %6 : vector<16x128xf32>
    %8 = arith.truncf %7 : vector<16x128xf32> to vector<16x128xbf16>
    %c0_6 = arith.constant 0 : index
    %c0_7 = arith.constant 0 : index
    %9 = vector.load %arg4[%c0_6, %c0_7] : memref<128x128xbf16, #tpu.memory_space<vmem>>, vector<128x128xbf16>
    %cst_8 = arith.constant dense<0.000000e+00> : vector<16x128xf32>
    %10 = tpu.matmul %8, %9, %cst_8 {dimension_numbers = #tpu.dot_dimension_numbers<[1], [0], [0], [1], [0, 0, 1, 1], [], []>} : vector<16x128xbf16>, vector<128x128xbf16>, vector<16x128xf32> -> vector<16x128xf32>
    %c0_9 = arith.constant 0 : index
    %c0_10 = arith.constant 0 : index
    %11 = vector.load %arg5[%c0_9, %c0_10] : memref<1x128xf32, #tpu.memory_space<vmem>>, vector<1x128xf32>
    %12 = vector.broadcast %11 : vector<1x128xf32> to vector<16x128xf32>
    %13 = arith.addf %10, %12 : vector<16x128xf32>
    %c0_11 = arith.constant 0 : index
    %c0_12 = arith.constant 0 : index
    %14 = vector.load %arg6[%c0_11, %c0_12] : memref<16x128xf32, #tpu.memory_space<vmem>>, vector<16x128xf32>
    tpu.vector_store %arg6[%c0_11, %c0_12], %13 {strides = array<i32>} : memref<16x128xf32, #tpu.memory_space<vmem>>, vector<16x128xf32>,
    return
  }
  func.func @transform_0(%arg0: i32) -> (i32, i32) {
    %c0_i32 = arith.constant 0 : i32
    %c0_i32_0 = arith.constant 0 : i32
    return %arg0, %c0_i32 : i32, i32
  }
  func.func @transform_1(%arg0: i32) -> (i32, i32) {
    %c0_i32 = arith.constant 0 : i32
    %c0_i32_0 = arith.constant 0 : i32
    %c0_i32_1 = arith.constant 0 : i32
    return %c0_i32, %c0_i32_0 : i32, i32
  }
  func.func @transform_2(%arg0: i32) -> (i32, i32) {
    %c0_i32 = arith.constant 0 : i32
    %c0_i32_0 = arith.constant 0 : i32
    %c0_i32_1 = arith.constant 0 : i32
    return %c0_i32, %c0_i32_0 : i32, i32
  }
  func.func @transform_3(%arg0: i32) -> (i32, i32) {
    %c0_i32 = arith.constant 0 : i32
    %c0_i32_0 = arith.constant 0 : i32
    %c0_i32_1 = arith.constant 0 : i32
    return %c0_i32, %c0_i32_0 : i32, i32
  }
  func.func @transform_4(%arg0: i32) -> (i32, i32) {
    %c0_i32 = arith.constant 0 : i32
    %c0_i32_0 = arith.constant 0 : i32
    %c0_i32_1 = arith.constant 0 : i32
    return %c0_i32, %c0_i32_0 : i32, i32
  }
  func.func @transform_5(%arg0: i32) -> (i32, i32) {
    %c0_i32 = arith.constant 0 : i32
    %c0_i32_0 = arith.constant 0 : i32
    return %arg0, %c0_i32 : i32, i32
  }
}

</mosaic_0001>

<bundles_post_ra>
// kernel: cnn_forward.3
= control target key start
LH: loop header
LB: loop body
LE: loop exit
PB: predicated region body
PF: predicated region fallthrough
CT: control target
= control target key end

     0   :  { %8 = vsyncpa [#allocation3], 0  ;;  %s978_s12 = smov 0   ;;  %s1195_s0 = inlined_call_operand.vmem [shape: bf16[64,192], index: 0, kind: input, shape index: {}]   ;;  %s1196_s1 = inlined_call_operand.vmem [shape: bf16[192,512], index: 1, kind: input, shape index: {}]   ;;  %s1197_s2 = inlined_call_operand.hbm [shape: f32[1,128], index: 2, kind: input, shape index: {}]   ;;  %s1198_s3 = inlined_call_operand.vmem [shape: bf16[64,128], index: 3, kind: output, shape index: {}]  }
   0x1 LB: > { %s729_s13 = sadd.s32 4294967295, %s955_s12   ;;  %p731_p0 = scmp.ge.s32.totalorder %s955_s12, 1  ;;  %s955_s12 = sphi %s978_s12, %s14_s12  }
   0x2   : > { %p113_p1 = scmp.lt.s32.totalorder %s955_s12, 3  ;;  %p992_p3 = scmp.eq.s32.totalorder %s729_s13, 0 }
   0x3   : > { %s957_s16 = smov [#allocation2]   ;;  %s917_s21 = scalar_lea.hbm %s1197_s2, 16 }
   0x4   : > { %p986_p2 = pnand %p731_p0, %p113_p1  ;;  %s129_s17 = sshll.u32 %s957_s16, 4  ;;  %s130_s17 = int_to_ptr.vmem [resolvable:$true] %s129_s17 }
   0x5   : > { %s1203_s15 = scalar_select %p992_p3, 1, 0 }
   0x6   : > { %s1202_s14 = scalar_select %p986_p2, 1, 0 }
   0x7   : > { %p824_p4 = pneg %p986_p2  ;;  %p918_p6 = scmp.ne.s32.totalorder %s1197_s2, %s917_s21 }
   0x8   : > { %p924_p10 = scmp.lt.u32.totalorder %s917_s21, %s1197_s2 }
   0x9   : > { %p1000_p5 = pnand %p992_p3, %p824_p4 }
   0xb   : > { %p919_p7 = pneg %p1000_p5 }
   0xd   : > { %p920_p8 = pnand %p919_p7, %p918_p6 }
   0xf   : > { %p921_p9 = pneg %p920_p8 }
  0x11   : > { %p926_p11 = pnand %p924_p10, %p921_p9 }
  0x13   : > { %929 = shalt.err (!%p926_p11)
}
  0x14   : > { %s930_s26 = scalar_lea.vmem %s130_s17, 16  ;;  %s937_s27 = scalar_lea.vmem %s130_s17, 32 }
  0x15   : > { %p931_p12 = scmp.ne.s32.totalorder %s130_s17, %s930_s26  ;;  %p938_p1 = scmp.lt.s32.totalorder %s130_s17, %s130_s17 }
  0x16   : > { %p939_p4 = scmp.lt.s32.totalorder %s937_s27, %s930_s26 }
  0x17   : > { %p933_p13 = pnand %p931_p12, %p919_p7 }
  0x18   : > { %p940_p3 = por %p939_p4, %p938_p1 }
  0x19   : > { %p934_p0 = pneg %p933_p13 }
  0x1b   : > { %p941_p2 = pnand %p940_p3, %p934_p0 }
  0x1d   : > { %944 = shalt.err (!%p941_p2)
}
  0x1e   : > { %827 = dma.hbm_to_vmem [thread:$0]  (!%p1000_p5), %s1197_s2, 16, %s130_s17, [#allocation3]  }
  0x1f   : > { %p1205_p6 = scmp.ne.s32.totalorder %s1202_s14, 0 }
  0x20   : > { %p1206_p8 = scmp.ne.s32.totalorder (!%p1205_p6), %s1203_s15, 0 }
  0x21   : > { %152 = sbr.rel (%p1205_p6) target bundleno = 324 (0x144), region = 32 }
  0x28   : > { %950 = dma.done.wait (%p1206_p8), [#allocation3], 16  }
  0x29   : > { %952 = vsyncadd (%p1206_p8), [#allocation3], 4294967280  ;;  %v839_v0 = vld [vmem:[%s1196_s1 + $0x4] ss:$16 sps:$4 sm:$0xff]   ;;  %v841_v1 = vld [vmem:[%s1196_s1 + $0xc] ss:$16 sps:$4 sm:$0xff]  }
  0x2a   : > { %508 = vmatprep.subr.bf16.mxu0 %v839_v0  ;;  %v843_v2 = vld [vmem:[%s1196_s1] ss:$16 sps:$4 sm:$0xff]   ;;  %v844_v3 = vld [vmem:[%s1196_s1 + $0x8] ss:$16 sps:$4 sm:$0xff]   ;;  %561 = vmatprep.subr.bf16.mxu1 %v841_v1  ;;  %v845_v4 = vld [vmem:[%s1196_s1 + $0x24] ss:$16 sps:$4 sm:$0xff]  }
  0x2b   : > { %509 = vmatpush1.bf16.msra.mxu0 %v843_v2  ;;  %562 = vmatpush1.bf16.msra.mxu1 %v844_v3  ;;  %v847_v5 = vld [vmem:[%s1196_s1 + $0x2c] ss:$16 sps:$4 sm:$0xff]   ;;  %v849_v6 = vld [vmem:[%s1196_s1 + $0x20] ss:$16 sps:$4 sm:$0xff]   ;;  %v850_v7 = vld [vmem:[%s1196_s1 + $0x28] ss:$16 sps:$4 sm:$0xff]  }
  0x2c   : > { %510 = vmatprep.subr.bf16.mxu0 %v845_v4  ;;  %563 = vmatprep.subr.bf16.mxu1 %v847_v5  ;;  %v851_v8 = vld [vmem:[%s1196_s1 + $0x44] ss:$16 sps:$4 sm:$0xff]   ;;  %v853_v9 = vld [vmem:[%s1196_s1 + $0x4c] ss:$16 sps:$4 sm:$0xff]   ;;  %v855_v10 = vld [vmem:[%s1196_s1 + $0x40] ss:$16 sps:$4 sm:$0xff]  }
  0x2d   : > { %v856_v11 = vld [vmem:[%s1196_s1 + $0x48] ss:$16 sps:$4 sm:$0xff]   ;;  %v857_v12 = vld [vmem:[%s1196_s1 + $0x64] ss:$16 sps:$4 sm:$0xff]   ;;  %v859_v13 = vld [vmem:[%s1196_s1 + $0x6c] ss:$16 sps:$4 sm:$0xff]  }
  0x2e   : > { %v861_v14 = vld [vmem:[%s1196_s1 + $0x60] ss:$16 sps:$4 sm:$0xff]   ;;  %v862_v15 = vld [vmem:[%s1196_s1 + $0x68] ss:$16 sps:$4 sm:$0xff]   ;;  %v863_v16 = vld [vmem:[%s1196_s1 + $0x84] ss:$16 sps:$4 sm:$0xff]  }
  0x2f   : > { %511 = vmatpush1.bf16.msra.mxu0 %v849_v6  ;;  %564 = vmatpush1.bf16.msra.mxu1 %v850_v7  ;;  %v865_v17 = vld [vmem:[%s1196_s1 + $0x8c] ss:$16 sps:$4 sm:$0xff]   ;;  %v867_v18 = vld [vmem:[%s1196_s1 + $0x80] ss:$16 sps:$4 sm:$0xff]   ;;  %v868_v19 = vld [vmem:[%s1196_s1 + $0x88] ss:$16 sps:$4 sm:$0xff]  }
  0x30   : > { %512 = vmatprep.subr.bf16.mxu0 %v851_v8  ;;  %565 = vmatprep.subr.bf16.mxu1 %v853_v9  ;;  %v869_v20 = vld [vmem:[%s1196_s1 + $0xa4] ss:$16 sps:$4 sm:$0xff]   ;;  %s736_s22 = sshll.u32 %s729_s13, 2  ;;  %v871_v21 = vld [vmem:[%s1196_s1 + $0xac] ss:$16 sps:$4 sm:$0xff]   ;;  %vm501_vm0 = vcmask 523264  }
  0x31   : > { %v873_v22 = vld [vmem:[%s1196_s1 + $0xa0] ss:$16 sps:$4 sm:$0xff]   ;;  %p178_p2 = scmp.lt.s32.totalorder %s736_s22, 7  ;;  %v874_v23 = vld [vmem:[%s1196_s1 + $0xa8] ss:$16 sps:$4 sm:$0xff]  }
  0x32   : > { %v875_v24 = vld [vmem:[%s1196_s1 + $0xc4] ss:$16 sps:$4 sm:$0xff]   ;;  %v877_v25 = vld [vmem:[%s1196_s1 + $0xcc] ss:$16 sps:$4 sm:$0xff]   ;;  %v879_v26 = vld [vmem:[%s1196_s1 + $0xc0] ss:$16 sps:$4 sm:$0xff]  }
  0x33   : > { %513 = vmatpush1.bf16.msra.mxu0 %v855_v10  ;;  %566 = vmatpush1.bf16.msra.mxu1 %v856_v11  ;;  %v880_v27 = vld [vmem:[%s1196_s1 + $0xc8] ss:$16 sps:$4 sm:$0xff]   ;;  %s1208_s22 = smov (!%p178_p2, %s736_s22), 7  ;;  %v881_v28 = vld [vmem:[%s1196_s1 + $0xe4] ss:$16 sps:$4 sm:$0xff]  }
  0x34   : > { %514 = vmatprep.subr.bf16.mxu0 %v857_v12  ;;  %567 = vmatprep.subr.bf16.mxu1 %v859_v13  ;;  %v883_v29 = vld [vmem:[%s1196_s1 + $0xec] ss:$16 sps:$4 sm:$0xff]   ;;  %v885_v30 = vld [vmem:[%s1196_s1 + $0xe0] ss:$16 sps:$4 sm:$0xff]   ;;  %s804_s17 = sshll.u32 %s1208_s22, 3 }
  0x35   : > { %v886_v31 = vld [vmem:[%s1196_s1 + $0xe8] ss:$16 sps:$4 sm:$0xff]   ;;  %v887_v32 = vld [vmem:[%s1196_s1 + $0x104] ss:$16 sps:$4 sm:$0xff]   ;;  %v889_v33 = vld [vmem:[%s1196_s1 + $0x10c] ss:$16 sps:$4 sm:$0xff]   ;;  %s1136_s27 = scalar_lea.vmem %s1195_s0, %s804_s17 }
  0x36   : > { %v891_v34 = vld [vmem:[%s1196_s1 + $0x100] ss:$16 sps:$4 sm:$0xff]   ;;  %v892_v35 = vld [vmem:[%s1196_s1 + $0x108] ss:$16 sps:$4 sm:$0xff]   ;;  %v893_v36 = vld [vmem:[%s1196_s1 + $0x124] ss:$16 sps:$4 sm:$0xff]  }
  0x37   : > { %515 = vmatpush1.bf16.msra.mxu0 %v861_v14  ;;  %568 = vmatpush1.bf16.msra.mxu1 %v862_v15  ;;  %v895_v37 = vld [vmem:[%s1196_s1 + $0x12c] ss:$16 sps:$4 sm:$0xff]   ;;  %v897_v39 = vld [vmem:[%s1196_s1 + $0x120] ss:$16 sps:$4 sm:$0xff]   ;;  %v898_v40 = vld [vmem:[%s1196_s1 + $0x128] ss:$16 sps:$4 sm:$0xff]  }
  0x38   : > { %516 = vmatprep.subr.bf16.mxu0 %v863_v16  ;;  %569 = vmatprep.subr.bf16.mxu1 %v865_v17  ;;  %v913_v38 = vld [vmem:[%s1136_s27 + $0x4] ss:$8 sps:$4 sm:$0xff]   ;;  %v903_v43 = vld [vmem:[%s1196_s1 + $0x140] ss:$16 sps:$4 sm:$0xff]   ;;  %v904_v44 = vld [vmem:[%s1196_s1 + $0x148] ss:$16 sps:$4 sm:$0xff]  }
  0x39   : > { %793 = vmatprep.mubr.msk.bf16.mxu0 %vm501_vm0, %v913_v38  ;;  %795 = vmatprep.mubr.msk.bf16.mxu1 %vm501_vm0, %v913_v38  ;;  %v899_v41 = vld [vmem:[%s1196_s1 + $0x144] ss:$16 sps:$4 sm:$0xff]   ;;  %v901_v42 = vld [vmem:[%s1196_s1 + $0x14c] ss:$16 sps:$4 sm:$0xff]   ;;  %v909_v47 = vld [vmem:[%s1196_s1 + $0x160] ss:$16 sps:$4 sm:$0xff]  }
  0x3a   : > { %v905_v45 = vld [vmem:[%s1196_s1 + $0x164] ss:$16 sps:$4 sm:$0xff]   ;;  %v907_v46 = vld [vmem:[%s1196_s1 + $0x16c] ss:$16 sps:$4 sm:$0xff]   ;;  %v910_v48 = vld [vmem:[%s1196_s1 + $0x168] ss:$16 sps:$4 sm:$0xff]  }
  0x3b   : > { %517 = vmatpush1.bf16.msra.mxu0 %v867_v18  ;;  %570 = vmatpush1.bf16.msra.mxu1 %v868_v19  ;;  %v911_v49 = vld [vmem:[%s1136_s27] ss:$8 sps:$4 sm:$0xff]   ;;  %v914_v50 = vld [vmem:[%s1136_s27 + $0x14] ss:$8 sps:$4 sm:$0xff]   ;;  %v916_v51 = vld [vmem:[%s1136_s27 + $0x10] ss:$8 sps:$4 sm:$0xff]  }
  0x3c   : > { %518 = vmatprep.subr.bf16.mxu0 %v869_v20  ;;  %571 = vmatprep.subr.bf16.mxu1 %v871_v21  ;;  %v797_v60 = vld [vmem:[#allocation2] ss:$0 sm:$0xff]  ;;  %s740_s27 = sshll.u32 %s1208_s22, 2 }
  0x3d   : > { %s188_s6 = scalar_lea.vmem %s1198_s3, %s740_s27 }
  0x3f   : > { %519 = vmatpush1.bf16.msra.mxu0 %v873_v22  ;;  %572 = vmatpush1.bf16.msra.mxu1 %v874_v23 }
  0x40   : > { %520 = vmatprep.subr.bf16.mxu0 %v875_v24  ;;  %573 = vmatprep.subr.bf16.mxu1 %v877_v25 }
  0x43   : > { %521 = vmatpush1.bf16.msra.mxu0 %v879_v26  ;;  %574 = vmatpush1.bf16.msra.mxu1 %v880_v27 }
  0x44   : > { %522 = vmatprep.subr.bf16.mxu0 %v881_v28  ;;  %575 = vmatprep.subr.bf16.mxu1 %v883_v29 }
  0x47   : > { %523 = vmatpush1.bf16.msra.mxu0 %v885_v30  ;;  %576 = vmatpush1.bf16.msra.mxu1 %v886_v31 }
  0x48   : > { %524 = vmatprep.subr.bf16.mxu0 %v887_v32  ;;  %577 = vmatprep.subr.bf16.mxu1 %v889_v33 }
  0x4b   : > { %525 = vmatpush1.bf16.msra.mxu0 %v891_v34  ;;  %578 = vmatpush1.bf16.msra.mxu1 %v892_v35 }
  0x4c   : > { %526 = vmatprep.subr.bf16.mxu0 %v893_v36  ;;  %579 = vmatprep.subr.bf16.mxu1 %v895_v37 }
  0x4f   : > { %527 = vmatpush1.bf16.msra.mxu0 %v897_v39  ;;  %580 = vmatpush1.bf16.msra.mxu1 %v898_v40 }
  0x50   : > { %528 = vmatprep.subr.bf16.mxu0 %v899_v41  ;;  %581 = vmatprep.subr.bf16.mxu1 %v901_v42 }
  0x53   : > { %529 = vmatpush1.bf16.msra.mxu0 %v903_v43  ;;  %582 = vmatpush1.bf16.msra.mxu1 %v904_v44 }
  0x54   : > { %530 = vmatprep.subr.bf16.mxu0 %v905_v45  ;;  %583 = vmatprep.subr.bf16.mxu1 %v907_v46 }
  0x57   : > { %531 = vmatpush1.bf16.msra.mxu0 %v909_v47  ;;  %584 = vmatpush1.bf16.msra.mxu1 %v910_v48 }
  0x5a   : > { %541 = vmatmul.mubr.bf16.vlgmr.msra.gmra.mrb[0].mxu0 %v911_v49  ;;  %594 = vmatmul.mubr.bf16.vlgmr.msra.gmra.mrb[0].mxu1 %v911_v49 }
  0x5b   : > { %794 = vmatprep.mubr.msk.bf16.mxu0 %vm501_vm0, %v914_v50  ;;  %796 = vmatprep.mubr.msk.bf16.mxu1 %vm501_vm0, %v914_v50 }
  0x62   : > { %551 = vmatmul.mubr.bf16.gmra.mrb[4].mxu0 %v916_v51  ;;  %604 = vmatmul.mubr.bf16.gmra.mrb[4].mxu1 %v916_v51 }
 0x12d   : > { %v542_v52 = vpop.f32.mrb[0].mxu0  ;;  %v595_v53 = vpop.f32.mrb[0].mxu1 }
 0x12e   : > { %v544_v54 = vpop.f32.mrb[1].mxu0  ;;  %v597_v55 = vpop.f32.mrb[1].mxu1 }
 0x12f   : > { %v614_v56 = vmax.f32 %v542_v52, %v544_v54  ;;  %v618_v57 = vmax.f32 %v595_v53, %v597_v55  ;;  %v546_v58 = vpop.f32.mrb[2].mxu0  ;;  %v599_v59 = vpop.f32.mrb[2].mxu1 }
 0x130   : > { %v548_v61 = vpop.f32.mrb[3].mxu0  ;;  %v601_v62 = vpop.f32.mrb[3].mxu1 }
 0x131   : > { %v622_v63 = vmax.f32 %v614_v56, %v618_v57  ;;  %v615_v0 = vmax.f32 %v546_v58, %v548_v61  ;;  %v619_v1 = vmax.f32 %v599_v59, %v601_v62 }
 0x133   : > { %v633_v2 = vadd.f32 %v797_v60, %v622_v63  ;;  %v623_v3 = vmax.f32 %v615_v0, %v619_v1 }
 0x135   : > { %v634_v4 = vadd.f32 %v797_v60, %v623_v3  ;;  %v552_v5 = vpop.f32.mrb[4].mxu0  ;;  %v605_v6 = vpop.f32.mrb[4].mxu1  ;;  %v637_v9 = vmax.f32 %v633_v2, 0.0 }
 0x136   : > { %v554_v7 = vpop.f32.mrb[5].mxu0  ;;  %v607_v8 = vpop.f32.mrb[5].mxu1 }
 0x137   : > { %v638_v10 = vmax.f32 %v634_v4, 0.0  ;;  %v616_v11 = vmax.f32 %v552_v5, %v554_v7  ;;  %v620_v12 = vmax.f32 %v605_v6, %v607_v8  ;;  %v556_v13 = vpop.f32.mrb[6].mxu0  ;;  %v609_v14 = vpop.f32.mrb[6].mxu1 }
 0x138   : > { %v558_v15 = vpop.f32.mrb[7].mxu0  ;;  %v611_v16 = vpop.f32.mrb[7].mxu1 }
 0x139   : > { %v812_v17 = vpack.c.bf16 %v638_v10, %v637_v9  ;;  %v624_v18 = vmax.f32 %v616_v11, %v620_v12  ;;  %v617_v19 = vmax.f32 %v556_v13, %v558_v15  ;;  %v621_v20 = vmax.f32 %v609_v14, %v611_v16 }
 0x13b   : > { %813 = vst [vmem:[%s188_s6] sm:$0xff] %v812_v17   ;;  %v635_v21 = vadd.f32 %v797_v60, %v624_v18  ;;  %v625_v22 = vmax.f32 %v617_v19, %v621_v20 }
 0x13d   : > { %v636_v23 = vadd.f32 %v797_v60, %v625_v22  ;;  %v639_v24 = vmax.f32 %v635_v21, 0.0 }
 0x13f   : > { %v640_v25 = vmax.f32 %v636_v23, 0.0 }
 0x141   : > { %v817_v26 = vpack.c.bf16 %v640_v25, %v639_v24 }
 0x143   : > { %819 = vst [vmem:[%s188_s6 + $0x8] sm:$0xff] %v817_v26  }
 0x144 PF: > { %s14_s12 = sadd.s32 1, %s955_s12  }
 0x145   : > { %p11_p3 = scmp.ge.s32.totalorder %s14_s12, 4  }
 0x147   :  { %13 = sbr.rel (!%p11_p3) target bundleno = 1 (0x1), region = 67 }
 0x14e   :  { %683 = vsyncpa [#allocation3], 1 }
 0x14f   :  { %685 = vsyncpa [#allocation3 + $0x1], 1 }

// kernel: cnn_forward.5
= control target key start
LH: loop header
LB: loop body
LE: loop exit
PB: predicated region body
PF: predicated region fallthrough
CT: control target
= control target key end

     0   :  { %v1078_v38 = vmov 0.0   ;;  %vm1079_vm0 = vmmov 0   ;;  %s1355_s1 = inlined_call_operand.vmem [shape: bf16[896,128], index: 1, kind: input, shape index: {}]   ;;  %s1356_s0 = inlined_call_operand.vmem [shape: bf16[16,896], index: 0, kind: input, shape index: {}]   ;;  %s1357_s3 = inlined_call_operand.vmem [shape: bf16[128,128], index: 3, kind: input, shape index: {}]   ;;  %s1358_s2 = inlined_call_operand.vmem [shape: f32[1,128], index: 2, kind: input, shape index: {}]   ;;  %s1359_s4 = inlined_call_operand.vmem [shape: f32[1,128], index: 4, kind: input, shape index: {}]   ;;  %s1360_s5 = inlined_call_operand.vmem [shape: f32[16,128], index: 5, kind: output, shape index: {}]  }
   0x1   :  { %v1004_v0 = vld [vmem:[%s1355_s1 + $0x40] sm:$0xff]   ;;  %v1008_v4 = vld [vmem:[%s1355_s1 + $0x48] sm:$0xff]   ;;  %v1012_v8 = vld [vmem:[%s1355_s1 + $0x50] sm:$0xff]  }
   0x2   :  { %v1005_v1 = vld [vmem:[%s1355_s1] sm:$0xff]   ;;  %878 = vmatprep.subr.bf16.mxu0 %v1004_v0  ;;  %v1009_v5 = vld [vmem:[%s1355_s1 + $0x8] sm:$0xff]   ;;  %v1013_v9 = vld [vmem:[%s1355_s1 + $0x10] sm:$0xff]  }
   0x3   :  { %v1006_v2 = vld [vmem:[%s1355_s1 + $0xc0] sm:$0xff]   ;;  %879 = vmatpush3.bf16.msra.mxu0 %v1005_v1  ;;  %v1010_v6 = vld [vmem:[%s1355_s1 + $0xc8] sm:$0xff]   ;;  %v1014_v10 = vld [vmem:[%s1355_s1 + $0xd0] sm:$0xff]  }
   0x4   :  { %v1007_v3 = vld [vmem:[%s1355_s1 + $0x80] sm:$0xff]   ;;  %900 = vmatprep.subr.bf16.mxu1 %v1006_v2  ;;  %880 = vmatprep.subr.bf16.mxu0 %v1008_v4  ;;  %v1011_v7 = vld [vmem:[%s1355_s1 + $0x88] sm:$0xff]   ;;  %v1015_v11 = vld [vmem:[%s1355_s1 + $0x90] sm:$0xff]  }
   0x5   :  { %901 = vmatpush3.bf16.msra.mxu1 %v1007_v3  ;;  %v1016_v12 = vld [vmem:[%s1355_s1 + $0x58] sm:$0xff]   ;;  %v1020_v16 = vld [vmem:[%s1355_s1 + $0x60] sm:$0xff]   ;;  %v1024_v20 = vld [vmem:[%s1355_s1 + $0x68] sm:$0xff]  }
   0x6   :  { %902 = vmatprep.subr.bf16.mxu1 %v1010_v6  ;;  %v1017_v13 = vld [vmem:[%s1355_s1 + $0x18] sm:$0xff]   ;;  %v1021_v17 = vld [vmem:[%s1355_s1 + $0x20] sm:$0xff]   ;;  %v1025_v21 = vld [vmem:[%s1355_s1 + $0x28] sm:$0xff]  }
   0x7   :  { %881 = vmatpush3.bf16.msra.mxu0 %v1009_v5  ;;  %v1018_v14 = vld [vmem:[%s1355_s1 + $0xd8] sm:$0xff]   ;;  %v1022_v18 = vld [vmem:[%s1355_s1 + $0xe0] sm:$0xff]   ;;  %v1026_v22 = vld [vmem:[%s1355_s1 + $0xe8] sm:$0xff]  }
   0x8   :  { %882 = vmatprep.subr.bf16.mxu0 %v1012_v8  ;;  %v1019_v15 = vld [vmem:[%s1355_s1 + $0x98] sm:$0xff]   ;;  %v1023_v19 = vld [vmem:[%s1355_s1 + $0xa0] sm:$0xff]   ;;  %v1027_v23 = vld [vmem:[%s1355_s1 + $0xa8] sm:$0xff]  }
   0x9   :  { %903 = vmatpush3.bf16.msra.mxu1 %v1011_v7  ;;  %v1028_v24 = vld [vmem:[%s1355_s1 + $0x70] sm:$0xff]   ;;  %v1032_v28 = vld [vmem:[%s1355_s1 + $0x78] sm:$0xff]   ;;  %v1037_v32 = vld [vmem:[%s1356_s0 + $0x4] ss:$28 sps:$4 sm:$0xff]  }
   0xa   :  { %904 = vmatprep.subr.bf16.mxu1 %v1014_v10  ;;  %v1029_v25 = vld [vmem:[%s1355_s1 + $0x30] sm:$0xff]   ;;  %v1033_v29 = vld [vmem:[%s1355_s1 + $0x38] sm:$0xff]   ;;  %552 = vmatprep.mubr.bf16.mxu0 %v1037_v32  ;;  %v1039_v34 = vld [vmem:[%s1355_s1 + $0x140] sm:$0xff]  }
   0xb   :  { %883 = vmatpush3.bf16.msra.mxu0 %v1013_v9  ;;  %v1030_v26 = vld [vmem:[%s1355_s1 + $0xf0] sm:$0xff]   ;;  %v1034_v30 = vld [vmem:[%s1355_s1 + $0xf8] sm:$0xff]   ;;  %v1040_v35 = vld [vmem:[%s1356_s0 + $0x8] ss:$28 sps:$4 sm:$0xff]  }
   0xc   :  { %884 = vmatprep.subr.bf16.mxu0 %v1016_v12  ;;  %v1031_v27 = vld [vmem:[%s1355_s1 + $0xb0] sm:$0xff]   ;;  %v1035_v31 = vld [vmem:[%s1356_s0] ss:$28 sps:$4 sm:$0xff]   ;;  %v1042_v36 = vld [vmem:[%s1356_s0 + $0xc] ss:$28 sps:$4 sm:$0xff]  }
   0xd   :  { %905 = vmatpush3.bf16.msra.mxu1 %v1015_v11  ;;  %v1038_v33 = vld [vmem:[%s1355_s1 + $0xb8] sm:$0xff]   ;;  %v1043_v37 = vld [vmem:[%s1355_s1 + $0x100] sm:$0xff]   ;;  %593 = vmatprep.mubr.bf16.mxu1 %v1042_v36  ;;  %v1045_v40 = vld [vmem:[%s1355_s1 + $0x148] sm:$0xff]  }
   0xe   :  { %906 = vmatprep.subr.bf16.mxu1 %v1018_v14  ;;  %v1044_v39 = vld [vmem:[%s1355_s1 + $0x180] sm:$0xff]   ;;  %v1046_v41 = vld [vmem:[%s1355_s1 + $0x108] sm:$0xff]   ;;  %v1048_v43 = vld [vmem:[%s1355_s1 + $0x150] sm:$0xff]  }
   0xf   :  { %885 = vmatpush3.bf16.msra.mxu0 %v1017_v13  ;;  %v1047_v42 = vld [vmem:[%s1355_s1 + $0x188] sm:$0xff]   ;;  %v1049_v44 = vld [vmem:[%s1355_s1 + $0x110] sm:$0xff]   ;;  %v1051_v46 = vld [vmem:[%s1355_s1 + $0x158] sm:$0xff]  }
  0x10   :  { %886 = vmatprep.subr.bf16.mxu0 %v1020_v16  ;;  %v1050_v45 = vld [vmem:[%s1355_s1 + $0x190] sm:$0xff]   ;;  %v1052_v47 = vld [vmem:[%s1355_s1 + $0x118] sm:$0xff]   ;;  %v1054_v49 = vld [vmem:[%s1355_s1 + $0x160] sm:$0xff]  }
  0x11   :  { %907 = vmatpush3.bf16.msra.mxu1 %v1019_v15  ;;  %v1053_v48 = vld [vmem:[%s1355_s1 + $0x198] sm:$0xff]   ;;  %v1055_v50 = vld [vmem:[%s1355_s1 + $0x120] sm:$0xff]   ;;  %v1057_v52 = vld [vmem:[%s1355_s1 + $0x168] sm:$0xff]  }
  0x12   :  { %908 = vmatprep.subr.bf16.mxu1 %v1022_v18  ;;  %v1056_v51 = vld [vmem:[%s1355_s1 + $0x1a0] sm:$0xff]   ;;  %v1058_v53 = vld [vmem:[%s1355_s1 + $0x128] sm:$0xff]   ;;  %v1060_v55 = vld [vmem:[%s1355_s1 + $0x170] sm:$0xff]  }
  0x13   :  { %887 = vmatpush3.bf16.msra.mxu0 %v1021_v17  ;;  %v1059_v54 = vld [vmem:[%s1355_s1 + $0x1a8] sm:$0xff]   ;;  %v1061_v56 = vld [vmem:[%s1355_s1 + $0x130] sm:$0xff]   ;;  %v1063_v59 = vld [vmem:[%s1355_s1 + $0x178] sm:$0xff]  }
  0x14   :  { %888 = vmatprep.subr.bf16.mxu0 %v1024_v20  ;;  %v1062_v57 = vld [vmem:[%s1355_s1 + $0x1b0] sm:$0xff]   ;;  %v1064_v60 = vld [vmem:[%s1355_s1 + $0x138] sm:$0xff]   ;;  %v1070_v0 = vld [vmem:[%s1357_s3] sm:$0xff]  }
  0x15   :  { %909 = vmatpush3.bf16.msra.mxu1 %v1023_v19  ;;  %v1067_v58 = vld [vmem:[%s1356_s0 + $0x14] ss:$28 sps:$4 sm:$0xff]   ;;  %v1068_v61 = vld [vmem:[%s1355_s1 + $0x1b8] sm:$0xff]   ;;  %v1071_v1 = vld [vmem:[%s1357_s3 + $0x8] sm:$0xff]  }
  0x16   :  { %910 = vmatprep.subr.bf16.mxu1 %v1026_v22  ;;  %v1065_v62 = vld [vmem:[%s1356_s0 + $0x10] ss:$28 sps:$4 sm:$0xff]   ;;  %v1069_v63 = vld [vmem:[%s1356_s0 + $0x18] ss:$28 sps:$4 sm:$0xff]   ;;  %v1074_v4 = vld [vmem:[%s1357_s3 + $0x20] sm:$0xff]  }
  0x17   :  { %889 = vmatpush3.bf16.msra.mxu0 %v1025_v21  ;;  %v1072_v2 = vld [vmem:[%s1357_s3 + $0x10] sm:$0xff]   ;;  %v1073_v3 = vld [vmem:[%s1357_s3 + $0x18] sm:$0xff]   ;;  %v1075_v5 = vld [vmem:[%s1357_s3 + $0x28] sm:$0xff]  }
  0x18   :  { %890 = vmatprep.subr.bf16.mxu0 %v1028_v24  ;;  %v1076_v6 = vld [vmem:[%s1357_s3 + $0x30] sm:$0xff]   ;;  %v1077_v7 = vld [vmem:[%s1357_s3 + $0x38] sm:$0xff]   ;;  %v805_v9 = vld [vmem:[%s1358_s2] ss:$0 sm:$0xff] }
  0x19   :  { %911 = vmatpush3.bf16.msra.mxu1 %v1027_v23 }
  0x1a   :  { %912 = vmatprep.subr.bf16.mxu1 %v1030_v26 }
  0x1b   :  { %891 = vmatpush3.bf16.msra.mxu0 %v1029_v25 }
  0x1c   :  { %892 = vmatprep.subr.bf16.mxu0 %v1032_v28 }
  0x1d   :  { %913 = vmatpush3.bf16.msra.mxu1 %v1031_v27 }
  0x1e   :  { %914 = vmatprep.subr.bf16.mxu1 %v1034_v30 }
  0x1f   :  { %893 = vmatpush3.bf16.msra.mxu0 %v1033_v29 }
  0x20   :  { %922 = vmatprep.subr.bf16.mxu0 %v1039_v34 }
  0x21   :  { %915 = vmatpush3.bf16.msra.mxu1 %v1038_v33 }
  0x22   :  { %553 = vmatmul.mubr.bf16.vlgmr.msra.gmra.mrb[0].mxu0 %v1035_v31  ;;  %962 = vmatprep.subr.bf16.mxu1 %v1078_v38 }
  0x23   :  { %923 = vmatpush3.bf16.msra.mxu0 %v1043_v37  ;;  %634 = vmatprep.mubr.bf16.mxu0 %v1067_v58 }
  0x24   :  { %594 = vmatmul.mubr.bf16.vlgmr.msra.gmra.mrb[0].mxu1 %v1040_v35  ;;  %924 = vmatprep.subr.bf16.mxu0 %v1045_v40 }
  0x25   :  { %963 = vmatpush3.bf16.msra.mxu1 %v1044_v39  ;;  %978 = vmatprep.mubr.msk.bf16.mxu1 %vm1079_vm0, %v1078_v38 }
  0x26   :  { %964 = vmatprep.subr.bf16.mxu1 %v1078_v38 }
  0x27   :  { %925 = vmatpush3.bf16.msra.mxu0 %v1046_v41 }
  0x28   :  { %926 = vmatprep.subr.bf16.mxu0 %v1048_v43 }
  0x29   :  { %965 = vmatpush3.bf16.msra.mxu1 %v1047_v42  ;;  %v869_v42 = vld [vmem:[%s1359_s4] ss:$0 sm:$0xff] }
  0x2a   :  { %966 = vmatprep.subr.bf16.mxu1 %v1078_v38 }
  0x2b   :  { %927 = vmatpush3.bf16.msra.mxu0 %v1049_v44 }
  0x2c   :  { %928 = vmatprep.subr.bf16.mxu0 %v1051_v46 }
  0x2d   :  { %967 = vmatpush3.bf16.msra.mxu1 %v1050_v45 }
  0x2e   :  { %968 = vmatprep.subr.bf16.mxu1 %v1078_v38 }
  0x2f   :  { %929 = vmatpush3.bf16.msra.mxu0 %v1052_v47 }
  0x30   :  { %930 = vmatprep.subr.bf16.mxu0 %v1054_v49 }
  0x31   :  { %969 = vmatpush3.bf16.msra.mxu1 %v1053_v48 }
  0x32   :  { %970 = vmatprep.subr.bf16.mxu1 %v1078_v38 }
  0x33   :  { %931 = vmatpush3.bf16.msra.mxu0 %v1055_v50 }
  0x34   :  { %932 = vmatprep.subr.bf16.mxu0 %v1057_v52 }
  0x35   :  { %971 = vmatpush3.bf16.msra.mxu1 %v1056_v51 }
  0x36   :  { %972 = vmatprep.subr.bf16.mxu1 %v1078_v38 }
  0x37   :  { %933 = vmatpush3.bf16.msra.mxu0 %v1058_v53 }
  0x38   :  { %934 = vmatprep.subr.bf16.mxu0 %v1060_v55 }
  0x39   :  { %973 = vmatpush3.bf16.msra.mxu1 %v1059_v54 }
  0x3a   :  { %974 = vmatprep.subr.bf16.mxu1 %v1078_v38 }
  0x3b   :  { %935 = vmatpush3.bf16.msra.mxu0 %v1061_v56 }
  0x3c   :  { %936 = vmatprep.subr.bf16.mxu0 %v1063_v59 }
  0x3d   :  { %975 = vmatpush3.bf16.msra.mxu1 %v1062_v57 }
  0x3e   :  { %976 = vmatprep.subr.bf16.mxu1 %v1078_v38 }
  0x3f   :  { %937 = vmatpush3.bf16.msra.mxu0 %v1064_v60 }
  0x40   :  { %982 = vmatprep.subr.bf16.mxu0 %v1078_v38 }
  0x41   :  { %977 = vmatpush3.bf16.msra.mxu1 %v1068_v61 }
  0x42   :  { %635 = vmatmul.mubr.bf16.vlgmr.msra.gmra.mrb[4].mxu0 %v1065_v62 }
  0x43   :  { %998 = vmatprep.mubr.msk.bf16.mxu0 %vm1079_vm0, %v1078_v38  ;;  %983 = vmatpush3.bf16.msra.mxu0 %v1070_v0 }
  0x44   :  { %979 = vmatmul.mubr.bf16.vlgmr.msra.gmra.mrb[4].mxu1 %v1069_v63  ;;  %984 = vmatprep.subr.bf16.mxu0 %v1078_v38 }
  0x47   :  { %985 = vmatpush3.bf16.msra.mxu0 %v1071_v1 }
  0x48   :  { %986 = vmatprep.subr.bf16.mxu0 %v1078_v38 }
  0x4b   :  { %987 = vmatpush3.bf16.msra.mxu0 %v1072_v2 }
  0x4c   :  { %988 = vmatprep.subr.bf16.mxu0 %v1078_v38 }
  0x4f   :  { %989 = vmatpush3.bf16.msra.mxu0 %v1073_v3 }
  0x50   :  { %990 = vmatprep.subr.bf16.mxu0 %v1078_v38 }
  0x53   :  { %991 = vmatpush3.bf16.msra.mxu0 %v1074_v4 }
  0x54   :  { %992 = vmatprep.subr.bf16.mxu0 %v1078_v38 }
  0x57   :  { %993 = vmatpush3.bf16.msra.mxu0 %v1075_v5 }
  0x58   :  { %994 = vmatprep.subr.bf16.mxu0 %v1078_v38 }
  0x5b   :  { %995 = vmatpush3.bf16.msra.mxu0 %v1076_v6 }
  0x5c   :  { %996 = vmatprep.subr.bf16.mxu0 %v1078_v38 }
  0x5f   :  { %997 = vmatpush3.bf16.msra.mxu0 %v1077_v7 }
  0xf5   :  { %v894_v8 = vpop.f32.mrb[0].mxu0 }
  0xf6   :  { %v895_v10 = vpop.f32.mrb[1].mxu0 }
  0xf7   :  { %v896_v11 = vadd.f32 %v895_v10, %v894_v8  ;;  %v897_v12 = vpop.f32.mrb[2].mxu0  ;;  %v916_v13 = vpop.f32.mrb[0].mxu1 }
  0xf8   :  { %v898_v14 = vpop.f32.mrb[3].mxu0  ;;  %v917_v17 = vpop.f32.mrb[1].mxu1 }
  0xf9   :  { %v555_v15 = vadd.f32 %v896_v11, %v805_v9  ;;  %v899_v16 = vadd.f32 %v898_v14, %v897_v12  ;;  %v918_v18 = vadd.f32 %v917_v17, %v916_v13  ;;  %v919_v19 = vpop.f32.mrb[2].mxu1 }
  0xfa   :  { %v920_v21 = vpop.f32.mrb[3].mxu1 }
  0xfb   :  { %v558_v20 = vadd.f32 %v899_v16, %v805_v9  ;;  %v596_v22 = vadd.f32 %v918_v18, %v555_v15  ;;  %v921_v23 = vadd.f32 %v920_v21, %v919_v19 }
  0xfd   :  { %v599_v24 = vadd.f32 %v921_v23, %v558_v20 }
 0x115   :  { %v938_v25 = vpop.f32.mrb[4].mxu0 }
 0x116   :  { %v939_v26 = vpop.f32.mrb[5].mxu0 }
 0x117   :  { %v677_v27 = vpop.f32.mrb[4].mxu1  ;;  %v940_v28 = vadd.f32 %v939_v26, %v938_v25  ;;  %v941_v29 = vpop.f32.mrb[6].mxu0 }
 0x118   :  { %v980_v30 = vpop.f32.mrb[5].mxu1  ;;  %v942_v31 = vpop.f32.mrb[7].mxu0 }
 0x119   :  { %v680_v32 = vpop.f32.mrb[6].mxu1  ;;  %v637_v33 = vadd.f32 %v940_v28, %v596_v22  ;;  %v943_v34 = vadd.f32 %v942_v31, %v941_v29 }
 0x11a   :  { %v981_v35 = vpop.f32.mrb[7].mxu1 }
 0x11b   :  { %v678_v36 = vadd.f32 %v677_v27, %v637_v33  ;;  %v640_v37 = vadd.f32 %v943_v34, %v599_v24 }
 0x11d   :  { %v681_v38 = vadd.f32 %v680_v32, %v640_v37  ;;  %v684_v39 = vmax.f32 %v678_v36, 0.0 }
 0x11f   :  { %v685_v40 = vmax.f32 %v681_v38, 0.0 }
 0x121   :  { %v686_v41 = vpack.c.bf16 %v685_v40, %v684_v39 }
 0x123   :  { %999 = vmatmul.mubr.bf16.vlgmr.msra.gmra.mrb[8].mxu0 %v686_v41 }
 0x1f6   :  { %v792_v43 = vpop.f32.mrb[8].mxu0 }
 0x1f7   :  { %v793_v44 = vadd.f32 %v869_v42, %v792_v43  ;;  %v1000_v45 = vpop.f32.mrb[9].mxu0 }
 0x1f8   :  { %v795_v46 = vpop.f32.mrb[10].mxu0 }
 0x1f9   :  { %799 = vst [vmem:[%s1360_s5] sm:$0xff] %v793_v44  ;;  %v796_v47 = vadd.f32 %v869_v42, %v795_v46  ;;  %v1001_v48 = vpop.f32.mrb[11].mxu0 }
 0x1fb   :  { %800 = vst [vmem:[%s1360_s5 + $0x8] sm:$0xff] %v796_v47 }

// kernel: cnn_forward.4
= control target key start
LH: loop header
LB: loop body
LE: loop exit
PB: predicated region body
PF: predicated region fallthrough
CT: control target
= control target key end

     0   :  { %s2275_s12 = smov 0   ;;  %s2885_s0 = inlined_call_operand.vmem [shape: bf16[32,768], index: 0, kind: input, shape index: {}]   ;;  %s2886_s1 = inlined_call_operand.vmem [shape: bf16[768,512], index: 1, kind: input, shape index: {}]   ;;  %s2887_s2 = inlined_call_operand.vmem [shape: f32[1,128], index: 2, kind: input, shape index: {}]   ;;  %s2888_s3 = inlined_call_operand.vmem [shape: bf16[32,128], index: 3, kind: output, shape index: {}]  }
   0x1 LB: > { %s1706_s13 = sadd.s32 4294967295, %s2253_s12   ;;  %p1710_p0 = scmp.ge.s32.totalorder %s2253_s12, 1  ;;  %s2253_s12 = sphi %s2275_s12, %s13_s12  }
   0x2   : > { %p139_p1 = scmp.lt.s32.totalorder %s2253_s12, 3 }
   0x4   : > { %p140_p2 = pnand %p1710_p0, %p139_p1 }
   0x5   : > { %v1950_v0 = vld [vmem:[%s2886_s1 + $0x4] ss:$16 sps:$4 sm:$0xff] (!%p140_p2)   ;;  %v1952_v1 = vld [vmem:[%s2886_s1 + $0xc] ss:$16 sps:$4 sm:$0xff] (!%p140_p2)   ;;  %v1954_v2 = vld [vmem:[%s2886_s1] ss:$16 sps:$4 sm:$0xff] (!%p140_p2)  }
   0x6   : > { %143 = sbr.rel (%p140_p2) target bundleno = 424 (0x1a8), region = 32  ;;  %1365 = vmatprep.subr.bf16.mxu0 (!%p140_p2), %v1950_v0  ;;  %v1955_v3 = vld [vmem:[%s2886_s1 + $0x8] ss:$16 sps:$4 sm:$0xff] (!%p140_p2)   ;;  %1494 = vmatprep.subr.bf16.mxu1 (!%p140_p2), %v1952_v1  ;;  %v1956_v4 = vld [vmem:[%s2886_s1 + $0x24] ss:$16 sps:$4 sm:$0xff] (!%p140_p2)   ;;  %s1711_s24 = sshll.u32 (!%p140_p2), %s1706_s13, 1 }
   0x7   : > { %1366 = vmatpush1.bf16.msra.mxu0 (!%p140_p2), %v1954_v2  ;;  %1495 = vmatpush1.bf16.msra.mxu1 (!%p140_p2), %v1955_v3  ;;  %v1958_v5 = vld [vmem:[%s2886_s1 + $0x2c] ss:$16 sps:$4 sm:$0xff] (!%p140_p2)   ;;  %v1960_v6 = vld [vmem:[%s2886_s1 + $0x20] ss:$16 sps:$4 sm:$0xff] (!%p140_p2)   ;;  %v1961_v7 = vld [vmem:[%s2886_s1 + $0x28] ss:$16 sps:$4 sm:$0xff] (!%p140_p2)  }
   0x8   : > { %1367 = vmatprep.subr.bf16.mxu0 (!%p140_p2), %v1956_v4  ;;  %1496 = vmatprep.subr.bf16.mxu1 (!%p140_p2), %v1958_v5  ;;  %v1962_v8 = vld [vmem:[%s2886_s1 + $0x44] ss:$16 sps:$4 sm:$0xff] (!%p140_p2)   ;;  %v1964_v9 = vld [vmem:[%s2886_s1 + $0x4c] ss:$16 sps:$4 sm:$0xff] (!%p140_p2)   ;;  %v1966_v10 = vld [vmem:[%s2886_s1 + $0x40] ss:$16 sps:$4 sm:$0xff] (!%p140_p2)  }
   0x9   : > { %v1967_v11 = vld [vmem:[%s2886_s1 + $0x48] ss:$16 sps:$4 sm:$0xff] (!%p140_p2)   ;;  %v1968_v12 = vld [vmem:[%s2886_s1 + $0x64] ss:$16 sps:$4 sm:$0xff] (!%p140_p2)   ;;  %v1970_v13 = vld [vmem:[%s2886_s1 + $0x6c] ss:$16 sps:$4 sm:$0xff] (!%p140_p2)  }
   0xa   : > { %v1972_v14 = vld [vmem:[%s2886_s1 + $0x60] ss:$16 sps:$4 sm:$0xff] (!%p140_p2)   ;;  %v1973_v15 = vld [vmem:[%s2886_s1 + $0x68] ss:$16 sps:$4 sm:$0xff] (!%p140_p2)   ;;  %v1974_v16 = vld [vmem:[%s2886_s1 + $0x84] ss:$16 sps:$4 sm:$0xff] (!%p140_p2)  }
   0xb   : > { %1368 = vmatpush1.bf16.msra.mxu0 (!%p140_p2), %v1960_v6  ;;  %1497 = vmatpush1.bf16.msra.mxu1 (!%p140_p2), %v1961_v7  ;;  %v1976_v17 = vld [vmem:[%s2886_s1 + $0x8c] ss:$16 sps:$4 sm:$0xff] (!%p140_p2)   ;;  %v1978_v18 = vld [vmem:[%s2886_s1 + $0x80] ss:$16 sps:$4 sm:$0xff] (!%p140_p2)   ;;  %v1979_v19 = vld [vmem:[%s2886_s1 + $0x88] ss:$16 sps:$4 sm:$0xff] (!%p140_p2)  }
   0xc   : > { %1369 = vmatprep.subr.bf16.mxu0 (!%p140_p2), %v1962_v8  ;;  %1498 = vmatprep.subr.bf16.mxu1 (!%p140_p2), %v1964_v9  ;;  %v1980_v20 = vld [vmem:[%s2886_s1 + $0xa4] ss:$16 sps:$4 sm:$0xff] (!%p140_p2)   ;;  %v1982_v21 = vld [vmem:[%s2886_s1 + $0xac] ss:$16 sps:$4 sm:$0xff] (!%p140_p2)   ;;  %v1984_v22 = vld [vmem:[%s2886_s1 + $0xa0] ss:$16 sps:$4 sm:$0xff] (!%p140_p2)  }
   0xd   : > { %v1985_v23 = vld [vmem:[%s2886_s1 + $0xa8] ss:$16 sps:$4 sm:$0xff]   ;;  %v1986_v24 = vld [vmem:[%s2886_s1 + $0xc4] ss:$16 sps:$4 sm:$0xff]   ;;  %v1988_v25 = vld [vmem:[%s2886_s1 + $0xcc] ss:$16 sps:$4 sm:$0xff]  }
   0xe   : > { %v1990_v26 = vld [vmem:[%s2886_s1 + $0xc0] ss:$16 sps:$4 sm:$0xff]   ;;  %v1991_v27 = vld [vmem:[%s2886_s1 + $0xc8] ss:$16 sps:$4 sm:$0xff]   ;;  %v1992_v28 = vld [vmem:[%s2886_s1 + $0xe4] ss:$16 sps:$4 sm:$0xff]  }
   0xf   : > { %1370 = vmatpush1.bf16.msra.mxu0 %v1966_v10  ;;  %1499 = vmatpush1.bf16.msra.mxu1 %v1967_v11  ;;  %v1994_v29 = vld [vmem:[%s2886_s1 + $0xec] ss:$16 sps:$4 sm:$0xff]   ;;  %v1996_v30 = vld [vmem:[%s2886_s1 + $0xe0] ss:$16 sps:$4 sm:$0xff]   ;;  %v1997_v31 = vld [vmem:[%s2886_s1 + $0xe8] ss:$16 sps:$4 sm:$0xff]  }
  0x10   : > { %1371 = vmatprep.subr.bf16.mxu0 %v1968_v12  ;;  %1500 = vmatprep.subr.bf16.mxu1 %v1970_v13  ;;  %v1998_v32 = vld [vmem:[%s2886_s1 + $0x104] ss:$16 sps:$4 sm:$0xff]   ;;  %p165_p3 = scmp.lt.s32.totalorder %s1711_s24, 3  ;;  %v2000_v33 = vld [vmem:[%s2886_s1 + $0x10c] ss:$16 sps:$4 sm:$0xff]  }
  0x11   : > { %v2002_v34 = vld [vmem:[%s2886_s1 + $0x100] ss:$16 sps:$4 sm:$0xff]   ;;  %v2003_v35 = vld [vmem:[%s2886_s1 + $0x108] ss:$16 sps:$4 sm:$0xff]   ;;  %v2004_v36 = vld [vmem:[%s2886_s1 + $0x124] ss:$16 sps:$4 sm:$0xff]  }
  0x12   : > { %s2890_s24 = smov (!%p165_p3, %s1711_s24), 3  ;;  %v2006_v37 = vld [vmem:[%s2886_s1 + $0x12c] ss:$16 sps:$4 sm:$0xff]   ;;  %v2008_v38 = vld [vmem:[%s2886_s1 + $0x120] ss:$16 sps:$4 sm:$0xff]  }
  0x13   : > { %1372 = vmatpush1.bf16.msra.mxu0 %v1972_v14  ;;  %1501 = vmatpush1.bf16.msra.mxu1 %v1973_v15  ;;  %v2009_v39 = vld [vmem:[%s2886_s1 + $0x128] ss:$16 sps:$4 sm:$0xff]   ;;  %v2010_v40 = vld [vmem:[%s2886_s1 + $0x144] ss:$16 sps:$4 sm:$0xff]   ;;  %s1941_s21 = smul.u32 24, %s2890_s24 }
  0x14   : > { %1373 = vmatprep.subr.bf16.mxu0 %v1974_v16  ;;  %1502 = vmatprep.subr.bf16.mxu1 %v1976_v17  ;;  %v2012_v41 = vld [vmem:[%s2886_s1 + $0x14c] ss:$16 sps:$4 sm:$0xff]   ;;  %v2014_v42 = vld [vmem:[%s2886_s1 + $0x140] ss:$16 sps:$4 sm:$0xff]   ;;  %v2015_v43 = vld [vmem:[%s2886_s1 + $0x148] ss:$16 sps:$4 sm:$0xff]  }
  0x15   : > { %v2016_v44 = vld [vmem:[%s2886_s1 + $0x164] ss:$16 sps:$4 sm:$0xff]   ;;  %s2426_s13 = scalar_lea.vmem %s2885_s0, %s1941_s21  ;;  %v2018_v45 = vld [vmem:[%s2886_s1 + $0x16c] ss:$16 sps:$4 sm:$0xff]   ;;  %v2020_v46 = vld [vmem:[%s2886_s1 + $0x160] ss:$16 sps:$4 sm:$0xff]  }
  0x16   : > { %v2021_v47 = vld [vmem:[%s2886_s1 + $0x168] ss:$16 sps:$4 sm:$0xff]   ;;  %v2048_v48 = vld [vmem:[%s2426_s13 + $0x4] ss:$24 sps:$4 sm:$0xff]   ;;  %v2026_v51 = vld [vmem:[%s2886_s1 + $0x180] ss:$16 sps:$4 sm:$0xff]  }
  0x17   : > { %1374 = vmatpush1.bf16.msra.mxu0 %v1978_v18  ;;  %1503 = vmatpush1.bf16.msra.mxu1 %v1979_v19  ;;  %v2022_v49 = vld [vmem:[%s2886_s1 + $0x184] ss:$16 sps:$4 sm:$0xff]   ;;  %v2024_v50 = vld [vmem:[%s2886_s1 + $0x18c] ss:$16 sps:$4 sm:$0xff]   ;;  %v2027_v52 = vld [vmem:[%s2886_s1 + $0x188] ss:$16 sps:$4 sm:$0xff]  }
  0x18   : > { %1375 = vmatprep.subr.bf16.mxu0 %v1980_v20  ;;  %1504 = vmatprep.subr.bf16.mxu1 %v1982_v21  ;;  %v2028_v53 = vld [vmem:[%s2886_s1 + $0x1a4] ss:$16 sps:$4 sm:$0xff]   ;;  %v2030_v54 = vld [vmem:[%s2886_s1 + $0x1ac] ss:$16 sps:$4 sm:$0xff]   ;;  %v2032_v55 = vld [vmem:[%s2886_s1 + $0x1a0] ss:$16 sps:$4 sm:$0xff]  }
  0x19   : > { %1397 = vmatprep.mubr.bf16.mxu0 %v2048_v48  ;;  %1526 = vmatprep.mubr.bf16.mxu1 %v2048_v48  ;;  %v2033_v56 = vld [vmem:[%s2886_s1 + $0x1a8] ss:$16 sps:$4 sm:$0xff]   ;;  %v2034_v57 = vld [vmem:[%s2886_s1 + $0x1c4] ss:$16 sps:$4 sm:$0xff]   ;;  %v2036_v58 = vld [vmem:[%s2886_s1 + $0x1cc] ss:$16 sps:$4 sm:$0xff]  }
  0x1a   : > { %v2038_v59 = vld [vmem:[%s2886_s1 + $0x1c0] ss:$16 sps:$4 sm:$0xff]   ;;  %v2039_v60 = vld [vmem:[%s2886_s1 + $0x1c8] ss:$16 sps:$4 sm:$0xff]   ;;  %v2040_v61 = vld [vmem:[%s2886_s1 + $0x1e4] ss:$16 sps:$4 sm:$0xff]  }
  0x1b   : > { %1376 = vmatpush1.bf16.msra.mxu0 %v1984_v22  ;;  %1505 = vmatpush1.bf16.msra.mxu1 %v1985_v23  ;;  %v2042_v62 = vld [vmem:[%s2886_s1 + $0x1ec] ss:$16 sps:$4 sm:$0xff]   ;;  %v2044_v63 = vld [vmem:[%s2886_s1 + $0x1e0] ss:$16 sps:$4 sm:$0xff]   ;;  %v2045_v0 = vld [vmem:[%s2886_s1 + $0x1e8] ss:$16 sps:$4 sm:$0xff]  }
  0x1c   : > { %1377 = vmatprep.subr.bf16.mxu0 %v1986_v24  ;;  %1506 = vmatprep.subr.bf16.mxu1 %v1988_v25  ;;  %v2051_v1 = vld [vmem:[%s2886_s1 + $0x204] ss:$16 sps:$4 sm:$0xff]   ;;  %v2054_v2 = vld [vmem:[%s2886_s1 + $0x20c] ss:$16 sps:$4 sm:$0xff]   ;;  %v2046_v3 = vld [vmem:[%s2426_s13] ss:$24 sps:$4 sm:$0xff]  }
  0x1d   : > { %v2049_v4 = vld [vmem:[%s2886_s1 + $0x200] ss:$16 sps:$4 sm:$0xff]   ;;  %v2052_v5 = vld [vmem:[%s2886_s1 + $0x208] ss:$16 sps:$4 sm:$0xff]   ;;  %v2057_v6 = vld [vmem:[%s2886_s1 + $0x224] ss:$16 sps:$4 sm:$0xff]  }
  0x1e   : > { %v2060_v7 = vld [vmem:[%s2886_s1 + $0x22c] ss:$16 sps:$4 sm:$0xff]   ;;  %v2055_v8 = vld [vmem:[%s2886_s1 + $0x220] ss:$16 sps:$4 sm:$0xff]   ;;  %v2058_v9 = vld [vmem:[%s2886_s1 + $0x228] ss:$16 sps:$4 sm:$0xff]  }
  0x1f   : > { %1378 = vmatpush1.bf16.msra.mxu0 %v1990_v26  ;;  %1507 = vmatpush1.bf16.msra.mxu1 %v1991_v27  ;;  %v2063_v10 = vld [vmem:[%s2886_s1 + $0x244] ss:$16 sps:$4 sm:$0xff]   ;;  %v2066_v11 = vld [vmem:[%s2886_s1 + $0x24c] ss:$16 sps:$4 sm:$0xff]   ;;  %v2061_v12 = vld [vmem:[%s2886_s1 + $0x240] ss:$16 sps:$4 sm:$0xff]  }
  0x20   : > { %1379 = vmatprep.subr.bf16.mxu0 %v1992_v28  ;;  %1508 = vmatprep.subr.bf16.mxu1 %v1994_v29  ;;  %v2064_v13 = vld [vmem:[%s2886_s1 + $0x248] ss:$16 sps:$4 sm:$0xff]   ;;  %v2069_v14 = vld [vmem:[%s2886_s1 + $0x264] ss:$16 sps:$4 sm:$0xff]   ;;  %v2072_v15 = vld [vmem:[%s2886_s1 + $0x26c] ss:$16 sps:$4 sm:$0xff]  }
  0x21   : > { %v2067_v16 = vld [vmem:[%s2886_s1 + $0x260] ss:$16 sps:$4 sm:$0xff]   ;;  %v2070_v17 = vld [vmem:[%s2886_s1 + $0x268] ss:$16 sps:$4 sm:$0xff]   ;;  %v2075_v18 = vld [vmem:[%s2886_s1 + $0x284] ss:$16 sps:$4 sm:$0xff]  }
  0x22   : > { %v2078_v19 = vld [vmem:[%s2886_s1 + $0x28c] ss:$16 sps:$4 sm:$0xff]   ;;  %v2073_v20 = vld [vmem:[%s2886_s1 + $0x280] ss:$16 sps:$4 sm:$0xff]   ;;  %v2076_v21 = vld [vmem:[%s2886_s1 + $0x288] ss:$16 sps:$4 sm:$0xff]  }
  0x23   : > { %1380 = vmatpush1.bf16.msra.mxu0 %v1996_v30  ;;  %1509 = vmatpush1.bf16.msra.mxu1 %v1997_v31  ;;  %v2081_v22 = vld [vmem:[%s2886_s1 + $0x2a4] ss:$16 sps:$4 sm:$0xff]   ;;  %v2084_v23 = vld [vmem:[%s2886_s1 + $0x2ac] ss:$16 sps:$4 sm:$0xff]   ;;  %v2079_v24 = vld [vmem:[%s2886_s1 + $0x2a0] ss:$16 sps:$4 sm:$0xff]  }
  0x24   : > { %1381 = vmatprep.subr.bf16.mxu0 %v1998_v32  ;;  %1510 = vmatprep.subr.bf16.mxu1 %v2000_v33  ;;  %v2082_v25 = vld [vmem:[%s2886_s1 + $0x2a8] ss:$16 sps:$4 sm:$0xff]   ;;  %v2087_v26 = vld [vmem:[%s2886_s1 + $0x2c4] ss:$16 sps:$4 sm:$0xff]   ;;  %v2090_v27 = vld [vmem:[%s2886_s1 + $0x2cc] ss:$16 sps:$4 sm:$0xff]  }
  0x25   : > { %v2085_v28 = vld [vmem:[%s2886_s1 + $0x2c0] ss:$16 sps:$4 sm:$0xff]   ;;  %v2088_v29 = vld [vmem:[%s2886_s1 + $0x2c8] ss:$16 sps:$4 sm:$0xff]   ;;  %v2147_v30 = vld [vmem:[%s2426_s13 + $0xc] ss:$24 sps:$4 sm:$0xff]  }
  0x26   : > { %v2093_v31 = vld [vmem:[%s2886_s1 + $0x2e4] ss:$16 sps:$4 sm:$0xff]   ;;  %v2096_v32 = vld [vmem:[%s2886_s1 + $0x2ec] ss:$16 sps:$4 sm:$0xff]   ;;  %v2091_v33 = vld [vmem:[%s2886_s1 + $0x2e0] ss:$16 sps:$4 sm:$0xff]  }
  0x27   : > { %1382 = vmatpush1.bf16.msra.mxu0 %v2002_v34  ;;  %1511 = vmatpush1.bf16.msra.mxu1 %v2003_v35  ;;  %v2094_v34 = vld [vmem:[%s2886_s1 + $0x2e8] ss:$16 sps:$4 sm:$0xff]   ;;  %v2099_v35 = vld [vmem:[%s2886_s1 + $0x304] ss:$16 sps:$4 sm:$0xff]   ;;  %v2120_v48 = vld [vmem:[%s2886_s1 + $0x36c] ss:$16 sps:$4 sm:$0xff]  }
  0x28   : > { %1383 = vmatprep.subr.bf16.mxu0 %v2004_v36  ;;  %1512 = vmatprep.subr.bf16.mxu1 %v2006_v37  ;;  %v2102_v36 = vld [vmem:[%s2886_s1 + $0x30c] ss:$16 sps:$4 sm:$0xff]   ;;  %v2097_v37 = vld [vmem:[%s2886_s1 + $0x300] ss:$16 sps:$4 sm:$0xff]  }
  0x2b   : > { %1384 = vmatpush1.bf16.msra.mxu0 %v2008_v38  ;;  %1513 = vmatpush1.bf16.msra.mxu1 %v2009_v39  ;;  %v2100_v38 = vld [vmem:[%s2886_s1 + $0x308] ss:$16 sps:$4 sm:$0xff]   ;;  %v2105_v39 = vld [vmem:[%s2886_s1 + $0x324] ss:$16 sps:$4 sm:$0xff]  }
  0x2c   : > { %1385 = vmatprep.subr.bf16.mxu0 %v2010_v40  ;;  %1514 = vmatprep.subr.bf16.mxu1 %v2012_v41  ;;  %v2108_v40 = vld [vmem:[%s2886_s1 + $0x32c] ss:$16 sps:$4 sm:$0xff]   ;;  %v2103_v41 = vld [vmem:[%s2886_s1 + $0x320] ss:$16 sps:$4 sm:$0xff]  }
  0x2f   : > { %1386 = vmatpush1.bf16.msra.mxu0 %v2014_v42  ;;  %1515 = vmatpush1.bf16.msra.mxu1 %v2015_v43  ;;  %v2106_v42 = vld [vmem:[%s2886_s1 + $0x328] ss:$16 sps:$4 sm:$0xff]   ;;  %v2111_v43 = vld [vmem:[%s2886_s1 + $0x344] ss:$16 sps:$4 sm:$0xff]  }
  0x30   : > { %1387 = vmatprep.subr.bf16.mxu0 %v2016_v44  ;;  %1516 = vmatprep.subr.bf16.mxu1 %v2018_v45  ;;  %v2114_v44 = vld [vmem:[%s2886_s1 + $0x34c] ss:$16 sps:$4 sm:$0xff]   ;;  %v2109_v45 = vld [vmem:[%s2886_s1 + $0x340] ss:$16 sps:$4 sm:$0xff]  }
  0x33   : > { %1388 = vmatpush1.bf16.msra.mxu0 %v2020_v46  ;;  %1517 = vmatpush1.bf16.msra.mxu1 %v2021_v47  ;;  %v2112_v46 = vld [vmem:[%s2886_s1 + $0x348] ss:$16 sps:$4 sm:$0xff]   ;;  %v2117_v47 = vld [vmem:[%s2886_s1 + $0x364] ss:$16 sps:$4 sm:$0xff]  }
  0x34   : > { %1389 = vmatprep.subr.bf16.mxu0 %v2022_v49  ;;  %1518 = vmatprep.subr.bf16.mxu1 %v2024_v50  ;;  %v2115_v49 = vld [vmem:[%s2886_s1 + $0x360] ss:$16 sps:$4 sm:$0xff]   ;;  %v2118_v50 = vld [vmem:[%s2886_s1 + $0x368] ss:$16 sps:$4 sm:$0xff]  }
  0x37   : > { %1390 = vmatpush1.bf16.msra.mxu0 %v2026_v51  ;;  %1519 = vmatpush1.bf16.msra.mxu1 %v2027_v52  ;;  %v2123_v51 = vld [vmem:[%s2886_s1 + $0x384] ss:$16 sps:$4 sm:$0xff]   ;;  %v2126_v52 = vld [vmem:[%s2886_s1 + $0x38c] ss:$16 sps:$4 sm:$0xff]  }
  0x38   : > { %1391 = vmatprep.subr.bf16.mxu0 %v2028_v53  ;;  %1520 = vmatprep.subr.bf16.mxu1 %v2030_v54  ;;  %v2121_v53 = vld [vmem:[%s2886_s1 + $0x380] ss:$16 sps:$4 sm:$0xff]   ;;  %v2124_v54 = vld [vmem:[%s2886_s1 + $0x388] ss:$16 sps:$4 sm:$0xff]  }
  0x3b   : > { %1392 = vmatpush1.bf16.msra.mxu0 %v2032_v55  ;;  %1521 = vmatpush1.bf16.msra.mxu1 %v2033_v56  ;;  %v2129_v55 = vld [vmem:[%s2886_s1 + $0x3a4] ss:$16 sps:$4 sm:$0xff]   ;;  %v2132_v56 = vld [vmem:[%s2886_s1 + $0x3ac] ss:$16 sps:$4 sm:$0xff]  }
  0x3c   : > { %1393 = vmatprep.subr.bf16.mxu0 %v2034_v57  ;;  %1522 = vmatprep.subr.bf16.mxu1 %v2036_v58  ;;  %v2127_v57 = vld [vmem:[%s2886_s1 + $0x3a0] ss:$16 sps:$4 sm:$0xff]   ;;  %v2130_v58 = vld [vmem:[%s2886_s1 + $0x3a8] ss:$16 sps:$4 sm:$0xff]  }
  0x3f   : > { %1394 = vmatpush1.bf16.msra.mxu0 %v2038_v59  ;;  %1523 = vmatpush1.bf16.msra.mxu1 %v2039_v60  ;;  %v2135_v59 = vld [vmem:[%s2886_s1 + $0x3c4] ss:$16 sps:$4 sm:$0xff]   ;;  %v2138_v60 = vld [vmem:[%s2886_s1 + $0x3cc] ss:$16 sps:$4 sm:$0xff]  }
  0x40   : > { %1395 = vmatprep.subr.bf16.mxu0 %v2040_v61  ;;  %1524 = vmatprep.subr.bf16.mxu1 %v2042_v62  ;;  %v2133_v61 = vld [vmem:[%s2886_s1 + $0x3c0] ss:$16 sps:$4 sm:$0xff]   ;;  %v2136_v62 = vld [vmem:[%s2886_s1 + $0x3c8] ss:$16 sps:$4 sm:$0xff]  }
  0x43   : > { %1396 = vmatpush1.bf16.msra.mxu0 %v2044_v63  ;;  %1525 = vmatpush1.bf16.msra.mxu1 %v2045_v0  ;;  %v2141_v63 = vld [vmem:[%s2886_s1 + $0x3e4] ss:$16 sps:$4 sm:$0xff]   ;;  %v2144_v0 = vld [vmem:[%s2886_s1 + $0x3ec] ss:$16 sps:$4 sm:$0xff]  }
  0x44   : > { %1408 = vmatprep.subr.bf16.mxu0 %v2051_v1  ;;  %1537 = vmatprep.subr.bf16.mxu1 %v2054_v2  ;;  %v2139_v1 = vld [vmem:[%s2886_s1 + $0x3e0] ss:$16 sps:$4 sm:$0xff]   ;;  %v2142_v2 = vld [vmem:[%s2886_s1 + $0x3e8] ss:$16 sps:$4 sm:$0xff]  }
  0x46   : > { %1398 = vmatmul.mubr.bf16.vlgmr.msra.gmra.mrb[0].mxu0 %v2046_v3  ;;  %1527 = vmatmul.mubr.bf16.vlgmr.msra.gmra.mrb[0].mxu1 %v2046_v3  ;;  %v2150_v3 = vld [vmem:[%s2886_s1 + $0x404] ss:$16 sps:$4 sm:$0xff]  }
  0x47   : > { %1409 = vmatpush1.bf16.msra.mxu0 %v2049_v4  ;;  %1538 = vmatpush1.bf16.msra.mxu1 %v2052_v5  ;;  %v2153_v4 = vld [vmem:[%s2886_s1 + $0x40c] ss:$16 sps:$4 sm:$0xff]   ;;  %v2145_v5 = vld [vmem:[%s2426_s13 + $0x8] ss:$24 sps:$4 sm:$0xff]  }
  0x48   : > { %1410 = vmatprep.subr.bf16.mxu0 %v2057_v6  ;;  %1539 = vmatprep.subr.bf16.mxu1 %v2060_v7  ;;  %v2148_v6 = vld [vmem:[%s2886_s1 + $0x400] ss:$16 sps:$4 sm:$0xff]   ;;  %v2151_v7 = vld [vmem:[%s2886_s1 + $0x408] ss:$16 sps:$4 sm:$0xff]  }
  0x49   : > { %1440 = vmatprep.mubr.bf16.mxu0 %v2147_v30  ;;  %1569 = vmatprep.mubr.bf16.mxu1 %v2147_v30  ;;  %v2189_v30 = vld [vmem:[%s2886_s1 + $0x4cc] ss:$16 sps:$4 sm:$0xff]  }
  0x4b   : > { %1411 = vmatpush1.bf16.msra.mxu0 %v2055_v8  ;;  %1540 = vmatpush1.bf16.msra.mxu1 %v2058_v9  ;;  %v2156_v8 = vld [vmem:[%s2886_s1 + $0x424] ss:$16 sps:$4 sm:$0xff]   ;;  %v2159_v9 = vld [vmem:[%s2886_s1 + $0x42c] ss:$16 sps:$4 sm:$0xff]  }
  0x4c   : > { %1412 = vmatprep.subr.bf16.mxu0 %v2063_v10  ;;  %1541 = vmatprep.subr.bf16.mxu1 %v2066_v11  ;;  %v2246_v10 = vld [vmem:[%s2426_s13 + $0x14] ss:$24 sps:$4 sm:$0xff]   ;;  %v2154_v11 = vld [vmem:[%s2886_s1 + $0x420] ss:$16 sps:$4 sm:$0xff]  }
  0x4f   : > { %1413 = vmatpush1.bf16.msra.mxu0 %v2061_v12  ;;  %1542 = vmatpush1.bf16.msra.mxu1 %v2064_v13  ;;  %v2157_v12 = vld [vmem:[%s2886_s1 + $0x428] ss:$16 sps:$4 sm:$0xff]   ;;  %v2162_v13 = vld [vmem:[%s2886_s1 + $0x444] ss:$16 sps:$4 sm:$0xff]  }
  0x50   : > { %1414 = vmatprep.subr.bf16.mxu0 %v2069_v14  ;;  %1543 = vmatprep.subr.bf16.mxu1 %v2072_v15  ;;  %v2165_v14 = vld [vmem:[%s2886_s1 + $0x44c] ss:$16 sps:$4 sm:$0xff]   ;;  %v2160_v15 = vld [vmem:[%s2886_s1 + $0x440] ss:$16 sps:$4 sm:$0xff]  }
  0x53   : > { %1415 = vmatpush1.bf16.msra.mxu0 %v2067_v16  ;;  %1544 = vmatpush1.bf16.msra.mxu1 %v2070_v17  ;;  %v2163_v16 = vld [vmem:[%s2886_s1 + $0x448] ss:$16 sps:$4 sm:$0xff]   ;;  %v2168_v17 = vld [vmem:[%s2886_s1 + $0x464] ss:$16 sps:$4 sm:$0xff]  }
  0x54   : > { %1416 = vmatprep.subr.bf16.mxu0 %v2075_v18  ;;  %1545 = vmatprep.subr.bf16.mxu1 %v2078_v19  ;;  %v2171_v18 = vld [vmem:[%s2886_s1 + $0x46c] ss:$16 sps:$4 sm:$0xff]   ;;  %v2166_v19 = vld [vmem:[%s2886_s1 + $0x460] ss:$16 sps:$4 sm:$0xff]  }
  0x57   : > { %1417 = vmatpush1.bf16.msra.mxu0 %v2073_v20  ;;  %1546 = vmatpush1.bf16.msra.mxu1 %v2076_v21  ;;  %v2169_v20 = vld [vmem:[%s2886_s1 + $0x468] ss:$16 sps:$4 sm:$0xff]   ;;  %v2174_v21 = vld [vmem:[%s2886_s1 + $0x484] ss:$16 sps:$4 sm:$0xff]  }
  0x58   : > { %1418 = vmatprep.subr.bf16.mxu0 %v2081_v22  ;;  %1547 = vmatprep.subr.bf16.mxu1 %v2084_v23  ;;  %v2177_v22 = vld [vmem:[%s2886_s1 + $0x48c] ss:$16 sps:$4 sm:$0xff]   ;;  %v2172_v23 = vld [vmem:[%s2886_s1 + $0x480] ss:$16 sps:$4 sm:$0xff]  }
  0x5b   : > { %1419 = vmatpush1.bf16.msra.mxu0 %v2079_v24  ;;  %1548 = vmatpush1.bf16.msra.mxu1 %v2082_v25  ;;  %v2175_v24 = vld [vmem:[%s2886_s1 + $0x488] ss:$16 sps:$4 sm:$0xff]   ;;  %v2180_v25 = vld [vmem:[%s2886_s1 + $0x4a4] ss:$16 sps:$4 sm:$0xff]  }
  0x5c   : > { %1420 = vmatprep.subr.bf16.mxu0 %v2087_v26  ;;  %1549 = vmatprep.subr.bf16.mxu1 %v2090_v27  ;;  %v2183_v26 = vld [vmem:[%s2886_s1 + $0x4ac] ss:$16 sps:$4 sm:$0xff]   ;;  %v2178_v27 = vld [vmem:[%s2886_s1 + $0x4a0] ss:$16 sps:$4 sm:$0xff]  }
  0x5f   : > { %1421 = vmatpush1.bf16.msra.mxu0 %v2085_v28  ;;  %1550 = vmatpush1.bf16.msra.mxu1 %v2088_v29  ;;  %v2181_v28 = vld [vmem:[%s2886_s1 + $0x4a8] ss:$16 sps:$4 sm:$0xff]   ;;  %v2186_v29 = vld [vmem:[%s2886_s1 + $0x4c4] ss:$16 sps:$4 sm:$0xff]  }
  0x60   : > { %1422 = vmatprep.subr.bf16.mxu0 %v2093_v31  ;;  %1551 = vmatprep.subr.bf16.mxu1 %v2096_v32  ;;  %v2184_v31 = vld [vmem:[%s2886_s1 + $0x4c0] ss:$16 sps:$4 sm:$0xff]   ;;  %v2187_v32 = vld [vmem:[%s2886_s1 + $0x4c8] ss:$16 sps:$4 sm:$0xff]  }
  0x63   : > { %1423 = vmatpush1.bf16.msra.mxu0 %v2091_v33  ;;  %1552 = vmatpush1.bf16.msra.mxu1 %v2094_v34  ;;  %v2192_v33 = vld [vmem:[%s2886_s1 + $0x4e4] ss:$16 sps:$4 sm:$0xff]   ;;  %v2195_v34 = vld [vmem:[%s2886_s1 + $0x4ec] ss:$16 sps:$4 sm:$0xff]  }
  0x64   : > { %1424 = vmatprep.subr.bf16.mxu0 %v2099_v35  ;;  %1553 = vmatprep.subr.bf16.mxu1 %v2102_v36  ;;  %v2190_v35 = vld [vmem:[%s2886_s1 + $0x4e0] ss:$16 sps:$4 sm:$0xff]   ;;  %v2193_v36 = vld [vmem:[%s2886_s1 + $0x4e8] ss:$16 sps:$4 sm:$0xff]  }
  0x67   : > { %1425 = vmatpush1.bf16.msra.mxu0 %v2097_v37  ;;  %1554 = vmatpush1.bf16.msra.mxu1 %v2100_v38  ;;  %v2198_v37 = vld [vmem:[%s2886_s1 + $0x504] ss:$16 sps:$4 sm:$0xff]   ;;  %v2201_v38 = vld [vmem:[%s2886_s1 + $0x50c] ss:$16 sps:$4 sm:$0xff]  }
  0x68   : > { %1426 = vmatprep.subr.bf16.mxu0 %v2105_v39  ;;  %1555 = vmatprep.subr.bf16.mxu1 %v2108_v40  ;;  %v2196_v39 = vld [vmem:[%s2886_s1 + $0x500] ss:$16 sps:$4 sm:$0xff]   ;;  %v2199_v40 = vld [vmem:[%s2886_s1 + $0x508] ss:$16 sps:$4 sm:$0xff]  }
  0x6b   : > { %1427 = vmatpush1.bf16.msra.mxu0 %v2103_v41  ;;  %1556 = vmatpush1.bf16.msra.mxu1 %v2106_v42  ;;  %v2204_v41 = vld [vmem:[%s2886_s1 + $0x524] ss:$16 sps:$4 sm:$0xff]   ;;  %v2207_v42 = vld [vmem:[%s2886_s1 + $0x52c] ss:$16 sps:$4 sm:$0xff]  }
  0x6c   : > { %1428 = vmatprep.subr.bf16.mxu0 %v2111_v43  ;;  %1557 = vmatprep.subr.bf16.mxu1 %v2114_v44  ;;  %v2202_v43 = vld [vmem:[%s2886_s1 + $0x520] ss:$16 sps:$4 sm:$0xff]   ;;  %v2205_v44 = vld [vmem:[%s2886_s1 + $0x528] ss:$16 sps:$4 sm:$0xff]  }
  0x6f   : > { %1429 = vmatpush1.bf16.msra.mxu0 %v2109_v45  ;;  %1558 = vmatpush1.bf16.msra.mxu1 %v2112_v46  ;;  %v2210_v45 = vld [vmem:[%s2886_s1 + $0x544] ss:$16 sps:$4 sm:$0xff]   ;;  %v2213_v46 = vld [vmem:[%s2886_s1 + $0x54c] ss:$16 sps:$4 sm:$0xff]  }
  0x70   : > { %1430 = vmatprep.subr.bf16.mxu0 %v2117_v47  ;;  %1559 = vmatprep.subr.bf16.mxu1 %v2120_v48  ;;  %v2208_v47 = vld [vmem:[%s2886_s1 + $0x540] ss:$16 sps:$4 sm:$0xff]   ;;  %v2211_v48 = vld [vmem:[%s2886_s1 + $0x548] ss:$16 sps:$4 sm:$0xff]  }
  0x73   : > { %1431 = vmatpush1.bf16.msra.mxu0 %v2115_v49  ;;  %1560 = vmatpush1.bf16.msra.mxu1 %v2118_v50  ;;  %v2216_v49 = vld [vmem:[%s2886_s1 + $0x564] ss:$16 sps:$4 sm:$0xff]   ;;  %v2219_v50 = vld [vmem:[%s2886_s1 + $0x56c] ss:$16 sps:$4 sm:$0xff]  }
  0x74   : > { %1432 = vmatprep.subr.bf16.mxu0 %v2123_v51  ;;  %1561 = vmatprep.subr.bf16.mxu1 %v2126_v52  ;;  %v2214_v51 = vld [vmem:[%s2886_s1 + $0x560] ss:$16 sps:$4 sm:$0xff]   ;;  %v2217_v52 = vld [vmem:[%s2886_s1 + $0x568] ss:$16 sps:$4 sm:$0xff]  }
  0x77   : > { %1433 = vmatpush1.bf16.msra.mxu0 %v2121_v53  ;;  %1562 = vmatpush1.bf16.msra.mxu1 %v2124_v54  ;;  %v2222_v53 = vld [vmem:[%s2886_s1 + $0x584] ss:$16 sps:$4 sm:$0xff]   ;;  %v2225_v54 = vld [vmem:[%s2886_s1 + $0x58c] ss:$16 sps:$4 sm:$0xff]  }
  0x78   : > { %1434 = vmatprep.subr.bf16.mxu0 %v2129_v55  ;;  %1563 = vmatprep.subr.bf16.mxu1 %v2132_v56  ;;  %v2220_v55 = vld [vmem:[%s2886_s1 + $0x580] ss:$16 sps:$4 sm:$0xff]   ;;  %v2223_v56 = vld [vmem:[%s2886_s1 + $0x588] ss:$16 sps:$4 sm:$0xff]  }
  0x7b   : > { %1435 = vmatpush1.bf16.msra.mxu0 %v2127_v57  ;;  %1564 = vmatpush1.bf16.msra.mxu1 %v2130_v58  ;;  %v2228_v57 = vld [vmem:[%s2886_s1 + $0x5a4] ss:$16 sps:$4 sm:$0xff]   ;;  %v2231_v58 = vld [vmem:[%s2886_s1 + $0x5ac] ss:$16 sps:$4 sm:$0xff]  }
  0x7c   : > { %1436 = vmatprep.subr.bf16.mxu0 %v2135_v59  ;;  %1565 = vmatprep.subr.bf16.mxu1 %v2138_v60  ;;  %v2226_v59 = vld [vmem:[%s2886_s1 + $0x5a0] ss:$16 sps:$4 sm:$0xff]   ;;  %v2229_v60 = vld [vmem:[%s2886_s1 + $0x5a8] ss:$16 sps:$4 sm:$0xff]  }
  0x7f   : > { %1437 = vmatpush1.bf16.msra.mxu0 %v2133_v61  ;;  %1566 = vmatpush1.bf16.msra.mxu1 %v2136_v62  ;;  %v2234_v61 = vld [vmem:[%s2886_s1 + $0x5c4] ss:$16 sps:$4 sm:$0xff]   ;;  %v2237_v62 = vld [vmem:[%s2886_s1 + $0x5cc] ss:$16 sps:$4 sm:$0xff]  }
  0x80   : > { %1438 = vmatprep.subr.bf16.mxu0 %v2141_v63  ;;  %1567 = vmatprep.subr.bf16.mxu1 %v2144_v0  ;;  %v2232_v63 = vld [vmem:[%s2886_s1 + $0x5c0] ss:$16 sps:$4 sm:$0xff]   ;;  %v2235_v0 = vld [vmem:[%s2886_s1 + $0x5c8] ss:$16 sps:$4 sm:$0xff]  }
  0x83   : > { %1439 = vmatpush1.bf16.msra.mxu0 %v2139_v1  ;;  %1568 = vmatpush1.bf16.msra.mxu1 %v2142_v2  ;;  %v2240_v1 = vld [vmem:[%s2886_s1 + $0x5e4] ss:$16 sps:$4 sm:$0xff]   ;;  %v2243_v2 = vld [vmem:[%s2886_s1 + $0x5ec] ss:$16 sps:$4 sm:$0xff]  }
  0x84   : > { %1451 = vmatprep.subr.bf16.mxu0 %v2150_v3  ;;  %1580 = vmatprep.subr.bf16.mxu1 %v2153_v4  ;;  %v2238_v3 = vld [vmem:[%s2886_s1 + $0x5e0] ss:$16 sps:$4 sm:$0xff]   ;;  %v2241_v4 = vld [vmem:[%s2886_s1 + $0x5e8] ss:$16 sps:$4 sm:$0xff]  }
  0x86   : > { %1441 = vmatmul.mubr.bf16.vlgmr.msra.gmra.mrb[0].mxu0 %v2145_v5  ;;  %1570 = vmatmul.mubr.bf16.vlgmr.msra.gmra.mrb[0].mxu1 %v2145_v5  ;;  %v2244_v5 = vld [vmem:[%s2426_s13 + $0x10] ss:$24 sps:$4 sm:$0xff]   ;;  %s1714_s13 = sshll.u32 %s2890_s24, 2 }
  0x87   : > { %1452 = vmatpush1.bf16.msra.mxu0 %v2148_v6  ;;  %1581 = vmatpush1.bf16.msra.mxu1 %v2151_v7  ;;  %s175_s18 = scalar_lea.vmem %s2888_s3, %s1714_s13 }
  0x88   : > { %1453 = vmatprep.subr.bf16.mxu0 %v2156_v8  ;;  %1582 = vmatprep.subr.bf16.mxu1 %v2159_v9 }
  0x89   : > { %1483 = vmatprep.mubr.bf16.mxu0 %v2246_v10  ;;  %1612 = vmatprep.mubr.bf16.mxu1 %v2246_v10 }
  0x8b   : > { %1454 = vmatpush1.bf16.msra.mxu0 %v2154_v11  ;;  %1583 = vmatpush1.bf16.msra.mxu1 %v2157_v12 }
  0x8c   : > { %1455 = vmatprep.subr.bf16.mxu0 %v2162_v13  ;;  %1584 = vmatprep.subr.bf16.mxu1 %v2165_v14  ;;  %v1913_v14 = vld [vmem:[%s2887_s2] ss:$0 sm:$0xff] }
  0x8f   : > { %1456 = vmatpush1.bf16.msra.mxu0 %v2160_v15  ;;  %1585 = vmatpush1.bf16.msra.mxu1 %v2163_v16 }
  0x90   : > { %1457 = vmatprep.subr.bf16.mxu0 %v2168_v17  ;;  %1586 = vmatprep.subr.bf16.mxu1 %v2171_v18 }
  0x93   : > { %1458 = vmatpush1.bf16.msra.mxu0 %v2166_v19  ;;  %1587 = vmatpush1.bf16.msra.mxu1 %v2169_v20 }
  0x94   : > { %1459 = vmatprep.subr.bf16.mxu0 %v2174_v21  ;;  %1588 = vmatprep.subr.bf16.mxu1 %v2177_v22 }
  0x97   : > { %1460 = vmatpush1.bf16.msra.mxu0 %v2172_v23  ;;  %1589 = vmatpush1.bf16.msra.mxu1 %v2175_v24 }
  0x98   : > { %1461 = vmatprep.subr.bf16.mxu0 %v2180_v25  ;;  %1590 = vmatprep.subr.bf16.mxu1 %v2183_v26 }
  0x9b   : > { %1462 = vmatpush1.bf16.msra.mxu0 %v2178_v27  ;;  %1591 = vmatpush1.bf16.msra.mxu1 %v2181_v28 }
  0x9c   : > { %1463 = vmatprep.subr.bf16.mxu0 %v2186_v29  ;;  %1592 = vmatprep.subr.bf16.mxu1 %v2189_v30 }
  0x9f   : > { %1464 = vmatpush1.bf16.msra.mxu0 %v2184_v31  ;;  %1593 = vmatpush1.bf16.msra.mxu1 %v2187_v32 }
  0xa0   : > { %1465 = vmatprep.subr.bf16.mxu0 %v2192_v33  ;;  %1594 = vmatprep.subr.bf16.mxu1 %v2195_v34 }
  0xa3   : > { %1466 = vmatpush1.bf16.msra.mxu0 %v2190_v35  ;;  %1595 = vmatpush1.bf16.msra.mxu1 %v2193_v36 }
  0xa4   : > { %1467 = vmatprep.subr.bf16.mxu0 %v2198_v37  ;;  %1596 = vmatprep.subr.bf16.mxu1 %v2201_v38 }
  0xa7   : > { %1468 = vmatpush1.bf16.msra.mxu0 %v2196_v39  ;;  %1597 = vmatpush1.bf16.msra.mxu1 %v2199_v40 }
  0xa8   : > { %1469 = vmatprep.subr.bf16.mxu0 %v2204_v41  ;;  %1598 = vmatprep.subr.bf16.mxu1 %v2207_v42 }
  0xab   : > { %1470 = vmatpush1.bf16.msra.mxu0 %v2202_v43  ;;  %1599 = vmatpush1.bf16.msra.mxu1 %v2205_v44 }
  0xac   : > { %1471 = vmatprep.subr.bf16.mxu0 %v2210_v45  ;;  %1600 = vmatprep.subr.bf16.mxu1 %v2213_v46 }
  0xaf   : > { %1472 = vmatpush1.bf16.msra.mxu0 %v2208_v47  ;;  %1601 = vmatpush1.bf16.msra.mxu1 %v2211_v48 }
  0xb0   : > { %1473 = vmatprep.subr.bf16.mxu0 %v2216_v49  ;;  %1602 = vmatprep.subr.bf16.mxu1 %v2219_v50 }
  0xb3   : > { %1474 = vmatpush1.bf16.msra.mxu0 %v2214_v51  ;;  %1603 = vmatpush1.bf16.msra.mxu1 %v2217_v52 }
  0xb4   : > { %1475 = vmatprep.subr.bf16.mxu0 %v2222_v53  ;;  %1604 = vmatprep.subr.bf16.mxu1 %v2225_v54 }
  0xb7   : > { %1476 = vmatpush1.bf16.msra.mxu0 %v2220_v55  ;;  %1605 = vmatpush1.bf16.msra.mxu1 %v2223_v56 }
  0xb8   : > { %1477 = vmatprep.subr.bf16.mxu0 %v2228_v57  ;;  %1606 = vmatprep.subr.bf16.mxu1 %v2231_v58 }
  0xbb   : > { %1478 = vmatpush1.bf16.msra.mxu0 %v2226_v59  ;;  %1607 = vmatpush1.bf16.msra.mxu1 %v2229_v60 }
  0xbc   : > { %1479 = vmatprep.subr.bf16.mxu0 %v2234_v61  ;;  %1608 = vmatprep.subr.bf16.mxu1 %v2237_v62 }
  0xbf   : > { %1480 = vmatpush1.bf16.msra.mxu0 %v2232_v63  ;;  %1609 = vmatpush1.bf16.msra.mxu1 %v2235_v0 }
  0xc0   : > { %1481 = vmatprep.subr.bf16.mxu0 %v2240_v1  ;;  %1610 = vmatprep.subr.bf16.mxu1 %v2243_v2 }
  0xc3   : > { %1482 = vmatpush1.bf16.msra.mxu0 %v2238_v3  ;;  %1611 = vmatpush1.bf16.msra.mxu1 %v2241_v4 }
  0xc6   : > { %1484 = vmatmul.mubr.bf16.vlgmr.msra.gmra.mrb[0].mxu0 %v2244_v5  ;;  %1613 = vmatmul.mubr.bf16.vlgmr.msra.gmra.mrb[0].mxu1 %v2244_v5 }
 0x199   : > { %v1485_v6 = vpop.f32.mrb[0].mxu0  ;;  %v1614_v7 = vpop.f32.mrb[0].mxu1 }
 0x19a   : > { %v1487_v8 = vpop.f32.mrb[1].mxu0  ;;  %v1616_v9 = vpop.f32.mrb[1].mxu1 }
 0x19b   : > { %v1623_v10 = vmax.f32 %v1485_v6, %v1487_v8  ;;  %v1625_v11 = vmax.f32 %v1614_v7, %v1616_v9  ;;  %v1489_v12 = vpop.f32.mrb[2].mxu0  ;;  %v1618_v13 = vpop.f32.mrb[2].mxu1 }
 0x19c   : > { %v1491_v15 = vpop.f32.mrb[3].mxu0  ;;  %v1620_v16 = vpop.f32.mrb[3].mxu1 }
 0x19d   : > { %v1627_v17 = vmax.f32 %v1623_v10, %v1625_v11  ;;  %v1624_v18 = vmax.f32 %v1489_v12, %v1491_v15  ;;  %v1626_v19 = vmax.f32 %v1618_v13, %v1620_v16 }
 0x19f   : > { %v1636_v20 = vadd.f32 %v1913_v14, %v1627_v17  ;;  %v1628_v21 = vmax.f32 %v1624_v18, %v1626_v19 }
 0x1a1   : > { %v1637_v22 = vadd.f32 %v1913_v14, %v1628_v21  ;;  %v1638_v23 = vmax.f32 %v1636_v20, 0.0 }
 0x1a3   : > { %v1639_v24 = vmax.f32 %v1637_v22, 0.0 }
 0x1a5   : > { %v1923_v25 = vpack.c.bf16 %v1639_v24, %v1638_v23 }
 0x1a7   : > { %1924 = vst [vmem:[%s175_s18] sm:$0xff] %v1923_v25  }
 0x1a8 PF: > { %s13_s12 = sadd.s32 1, %s2253_s12  }
 0x1a9   : > { %p10_p4 = scmp.ge.s32.totalorder %s13_s12, 4  }
 0x1ab   :  { %12 = sbr.rel (!%p10_p4) target bundleno = 1 (0x1), region = 62 }

</bundles_post_ra>
